<compile_context>
chip_gen: v6e
topology: v6e:2x2x1
jax: 0.10.0
libtpu: 0.0.40
codegen_flags: <defaults>
</compile_context>

<pallas_src>
import math
from functools import partial

import jax
import jax.numpy as jnp
from jax.experimental import pallas as pl
from jax.experimental.pallas import tpu as pltpu


# ---------------------------------------------------------------------------
# Helpers
# ---------------------------------------------------------------------------
def _layer_norm(x, w, b, eps=1e-5):
    # PyTorch nn.LayerNorm: population variance, eps inside sqrt.
    mu = jnp.mean(x, axis=-1, keepdims=True)
    var = jnp.mean((x - mu) ** 2, axis=-1, keepdims=True)
    return (x - mu) * jax.lax.rsqrt(var + eps) * w + b


# ---------------------------------------------------------------------------
# Fused encoder kernel: grid = (batch_blocks, num_layers)
# ---------------------------------------------------------------------------
def fused_encoder_kernel(x_ref,
                         in_w_ref, in_b_ref, out_w_ref, out_b_ref,
                         ln1_w_ref, ln1_b_ref, w1_ref, b1_ref,
                         w2_ref, b2_ref, ln2_w_ref, ln2_b_ref,
                         o_ref, acts_ref,
                         *, num_heads, bblk, seq_len):
    layer = pl.program_id(1)
    n_layers = pl.num_programs(1)
    R, D = acts_ref.shape                      # R = bblk * seq_len
    hd = D // num_heads
    cdt = in_w_ref.dtype                       # matmul compute dtype (f32 or bf16)

    # Layer 0 of each batch block: load the input once into the VMEM-resident
    # activation scratch (it stays resident across the whole layer sweep).
    @pl.when(layer == 0)
    def _():
        acts_ref[...] = x_ref[...].reshape(R, D).astype(jnp.float32)

    x = acts_ref[...]                          # (R, D) f32

    # Hoisted parameter loads (biases / LN params read & broadcast once).
    in_w = in_w_ref[0]                         # (D, 3D)  pre-transposed, Q-scale folded in
    in_b = in_b_ref[0]                         # (1, 3D)
    out_w = out_w_ref[0]                       # (D, D)
    out_b = out_b_ref[0]                       # (1, D)
    ln1_w = ln1_w_ref[0]; ln1_b = ln1_b_ref[0]
    w1 = w1_ref[0]; b1 = b1_ref[0]             # (D, F), (1, F)
    w2 = w2_ref[0]; b2 = b2_ref[0]             # (F, D), (1, D)
    ln2_w = ln2_w_ref[0]; ln2_b = ln2_b_ref[0]

    # ---- QKV projection for all collapsed rows at once (single MXU matmul) ----
    qkv = jnp.dot(x.astype(cdt), in_w,
                  preferred_element_type=jnp.float32) + in_b     # (R, 3D)

    # ---- Multi-head self-attention: static loop over heads, batched over the
    #      batch block with single-batch-dim einsums (flash-kernel pattern). ----
    head_outs = []
    for h in range(num_heads):                 # static, small head count
        q_lo = h * hd
        qh = qkv[:, q_lo:q_lo + hd].reshape(bblk, seq_len, hd)           # scaled Q
        kh = qkv[:, D + q_lo:D + q_lo + hd].reshape(bblk, seq_len, hd)
        vh = qkv[:, 2 * D + q_lo:2 * D + q_lo + hd].reshape(bblk, seq_len, hd)
        sc = jnp.einsum('bqd,bkd->bqk', qh.astype(cdt), kh.astype(cdt),
                        preferred_element_type=jnp.float32)              # (b, S, S)
        sc = sc - jnp.max(sc, axis=-1, keepdims=True)
        p = jnp.exp(sc)
        p = p * pl.reciprocal(jnp.sum(p, axis=-1, keepdims=True), approx=True)
        oh = jnp.einsum('bqk,bkd->bqd', p.astype(cdt), vh.astype(cdt),
                        preferred_element_type=jnp.float32)              # (b, S, hd)
        head_outs.append(oh)
    attn = jnp.concatenate(head_outs, axis=-1).reshape(R, D)             # (R, D)

    attn = jnp.dot(attn.astype(cdt), out_w,
                   preferred_element_type=jnp.float32) + out_b

    # ---- residual + LayerNorm 1 ----
    s = _layer_norm(attn + x, ln1_w, ln1_b)

    # ---- FFN: Linear -> LeakyReLU -> Linear ----
    h1 = jnp.dot(s.astype(cdt), w1, preferred_element_type=jnp.float32) + b1
    h1 = jnp.maximum(h1, 0.01 * h1)            # LeakyReLU(negative_slope=0.01)
    ffn = jnp.dot(h1.astype(cdt), w2, preferred_element_type=jnp.float32) + b2

    # ---- residual + LayerNorm 2 ----
    out = _layer_norm(ffn + s, ln2_w, ln2_b)

    acts_ref[...] = out                        # carry activation to next layer

    @pl.when(layer == n_layers - 1)
    def _():
        o_ref[...] = out.reshape(bblk, seq_len, D).astype(o_ref.dtype)


# ---------------------------------------------------------------------------
# Host-side parameter prep: transpose weights, fold Q scale, stack over layers.
# ---------------------------------------------------------------------------
def prepare_encoder_params(layer_params, num_heads, compute_dtype=jnp.float32):
    D = layer_params[0]["in_w"].shape[1]
    hd = D // num_heads
    qscale = 1.0 / math.sqrt(hd)

    def prep(p):
        in_w = p["in_w"].T                       # (D, 3D)
        in_b = p["in_b"].reshape(1, -1)          # (1, 3D)
        in_w = in_w.at[:, :D].multiply(qscale)   # fold 1/sqrt(hd) into W_q, b_q
        in_b = in_b.at[:, :D].multiply(qscale)
        return [
            in_w.astype(compute_dtype), in_b,
            p["out_w"].T.astype(compute_dtype), p["out_b"].reshape(1, -1),
            p["ln1_w"].reshape(1, -1), p["ln1_b"].reshape(1, -1),
            p["w1"].T.astype(compute_dtype), p["b1"].reshape(1, -1),
            p["w2"].T.astype(compute_dtype), p["b2"].reshape(1, -1),
            p["ln2_w"].reshape(1, -1), p["ln2_b"].reshape(1, -1),
        ]

    per_layer = [prep(p) for p in layer_params]
    # Stack each parameter over layers -> leading L dim indexed by the layer grid axis.
    return [jnp.stack([lp[i] for lp in per_layer], axis=0)
            for i in range(len(per_layer[0]))]


# ---------------------------------------------------------------------------
# Wrapper: one pallas_call for the whole stacked encoder.
# ---------------------------------------------------------------------------
def transformer_encoder_pallas(x, layer_params, num_heads, *,
                               batch_block=None, compute_dtype=jnp.float32):
    B, S, D = x.shape
    L = len(layer_params)
    stacked = prepare_encoder_params(layer_params, num_heads, compute_dtype)

    if batch_block is None:
        # Collapse enough batch rows per step to feed the MXU (target M >= 128
        # rows) while leaving multiple parallel batch blocks when B is large.
        batch_block = min(B, max(1, 128 // S))
    while B % batch_block:                       # must evenly divide the batch
        batch_block -= 1
    grid = (B // batch_block, L)                 # (parallel batch, arbitrary layers)

    x_spec = pl.BlockSpec((batch_block, S, D), lambda bi, li: (bi, 0, 0))
    w_specs = [pl.BlockSpec((1,) + tuple(a.shape[1:]), lambda bi, li: (li, 0, 0))
               for a in stacked]
    out_spec = pl.BlockSpec((batch_block, S, D), lambda bi, li: (bi, 0, 0))

    kern = partial(fused_encoder_kernel, num_heads=num_heads,
                   bblk=batch_block, seq_len=S)

    return pl.pallas_call(
        kern,
        out_shape=jax.ShapeDtypeStruct((B, S, D), x.dtype),
        grid=grid,
        in_specs=[x_spec] + w_specs,
        out_specs=out_spec,
        scratch_shapes=[pltpu.VMEM((batch_block * S, D), jnp.float32)],
        compiler_params=pltpu.CompilerParams(
            dimension_semantics=("parallel", "arbitrary"),
            vmem_limit_bytes=48 * 1024 * 1024,
        ),
    )(x, *stacked)


# ---------------------------------------------------------------------------
# Pure-JAX reference (mirrors the PyTorch forward) for correctness checking.
# ---------------------------------------------------------------------------
def _ln_ref(x, w, b, eps=1e-5):
    mu = jnp.mean(x, axis=-1, keepdims=True)
    var = jnp.mean((x - mu) ** 2, axis=-1, keepdims=True)
    return (x - mu) / jnp.sqrt(var + eps) * w + b


def transformer_block_ref(x, p, num_heads):
    B, S, D = x.shape
    hd = D // num_heads
    qkv = x @ p["in_w"].T + p["in_b"]
    q, k, v = qkv[..., :D], qkv[..., D:2 * D], qkv[..., 2 * D:]
    q = q.reshape(B, S, num_heads, hd).transpose(0, 2, 1, 3) / math.sqrt(hd)
    k = k.reshape(B, S, num_heads, hd).transpose(0, 2, 1, 3)
    v = v.reshape(B, S, num_heads, hd).transpose(0, 2, 1, 3)
    sc = q @ k.transpose(0, 1, 3, 2)
    pw = jax.nn.softmax(sc, axis=-1)
    a = (pw @ v).transpose(0, 2, 1, 3).reshape(B, S, D)
    a = a @ p["out_w"].T + p["out_b"]
    s = _ln_ref(a + x, p["ln1_w"], p["ln1_b"])
    h1 = s @ p["w1"].T + p["b1"]
    h1 = jnp.where(h1 >= 0, h1, 0.01 * h1)
    ffn = h1 @ p["w2"].T + p["b2"]
    return _ln_ref(ffn + s, p["ln2_w"], p["ln2_b"])


def transformer_encoder_ref(x, layer_params, num_heads):
    for p in layer_params:
        x = transformer_block_ref(x, p, num_heads)
    return x


# ---------------------------------------------------------------------------
# Deterministic parameter construction (synthetic; PyTorch-layout weights).
# ---------------------------------------------------------------------------
def init_layer_params(key, model_dim, ffn_dim):
    ks = jax.random.split(key, 6)
    s = 0.05
    return {
        "in_w":  s * jax.random.normal(ks[0], (3 * model_dim, model_dim), jnp.float32),
        "in_b":  s * jax.random.normal(ks[1], (3 * model_dim,), jnp.float32),
        "out_w": s * jax.random.normal(ks[2], (model_dim, model_dim), jnp.float32),
        "out_b": s * jax.random.normal(ks[3], (model_dim,), jnp.float32),
        "ln1_w": jnp.ones((model_dim,), jnp.float32),
        "ln1_b": jnp.zeros((model_dim,), jnp.float32),
        "w1":    s * jax.random.normal(ks[4], (ffn_dim, model_dim), jnp.float32),
        "b1":    jnp.zeros((ffn_dim,), jnp.float32),
        "w2":    s * jax.random.normal(ks[5], (model_dim, ffn_dim), jnp.float32),
        "b2":    jnp.zeros((model_dim,), jnp.float32),
        "ln2_w": jnp.ones((model_dim,), jnp.float32),
        "ln2_b": jnp.zeros((model_dim,), jnp.float32),
    }


if __name__ == "__main__":
    B, S, D, H = 2, 8, 32, 4          # batch, seq_len, model_dim, num_heads
    num_layers = 2                    # stacked_transformer_layers

    key = jax.random.PRNGKey(0)
    kx, kp = jax.random.split(key)
    x = jax.random.normal(kx, (B, S, D), jnp.float32)

    layer_keys = jax.random.split(kp, num_layers)
    layer_params = [init_layer_params(k, D, D) for k in layer_keys]

    out = transformer_encoder_pallas(x, layer_params, H)
    out = jax.block_until_ready(out)

    ref = transformer_encoder_ref(x, layer_params, H)
    assert out.shape == (B, S, D)
    err = jnp.max(jnp.abs(out - ref))
    assert jnp.allclose(out, ref, rtol=5e-3, atol=5e-3), f"max err {err}"

    print("KERNEL_OK")
</pallas_src>

<mosaic_0001>
module attributes {stable_mosaic.version = 11 : i64} {
  func.func @fused_encoder_kernel(%arg0: i32, %arg1: i32, %arg2: memref<2x8x32xf32, #tpu.memory_space<vmem>>, %arg3: memref<1x32x96xf32, #tpu.memory_space<vmem>>, %arg4: memref<1x1x96xf32, #tpu.memory_space<vmem>>, %arg5: memref<1x32x32xf32, #tpu.memory_space<vmem>>, %arg6: memref<1x1x32xf32, #tpu.memory_space<vmem>>, %arg7: memref<1x1x32xf32, #tpu.memory_space<vmem>>, %arg8: memref<1x1x32xf32, #tpu.memory_space<vmem>>, %arg9: memref<1x32x32xf32, #tpu.memory_space<vmem>>, %arg10: memref<1x1x32xf32, #tpu.memory_space<vmem>>, %arg11: memref<1x32x32xf32, #tpu.memory_space<vmem>>, %arg12: memref<1x1x32xf32, #tpu.memory_space<vmem>>, %arg13: memref<1x1x32xf32, #tpu.memory_space<vmem>>, %arg14: memref<1x1x32xf32, #tpu.memory_space<vmem>>, %arg15: memref<2x8x32xf32, #tpu.memory_space<vmem>>, %arg16: memref<16x32xf32, #tpu.memory_space<vmem>>) attributes {dimension_semantics = [#tpu.dimension_semantics<parallel>, #tpu.dimension_semantics<arbitrary>], iteration_bounds = array<i64: 1, 2>, scalar_prefetch = 0 : i64, scratch_operands = 1 : i64, tpu.core_type = #tpu.core_type<tc>, window_params = [{transform_indices = @transform_0, window_bounds = array<i64: 2, 8, 32>}, {transform_indices = @transform_1, window_bounds = array<i64: 1, 32, 96>}, {transform_indices = @transform_2, window_bounds = array<i64: 1, 1, 96>}, {transform_indices = @transform_3, window_bounds = array<i64: 1, 32, 32>}, {transform_indices = @transform_4, window_bounds = array<i64: 1, 1, 32>}, {transform_indices = @transform_5, window_bounds = array<i64: 1, 1, 32>}, {transform_indices = @transform_6, window_bounds = array<i64: 1, 1, 32>}, {transform_indices = @transform_7, window_bounds = array<i64: 1, 32, 32>}, {transform_indices = @transform_8, window_bounds = array<i64: 1, 1, 32>}, {transform_indices = @transform_9, window_bounds = array<i64: 1, 32, 32>}, {transform_indices = @transform_10, window_bounds = array<i64: 1, 1, 32>}, {transform_indices = @transform_11, window_bounds = array<i64: 1, 1, 32>}, {transform_indices = @transform_12, window_bounds = array<i64: 1, 1, 32>}, {transform_indices = @transform_13, window_bounds = array<i64: 2, 8, 32>}]} {
    %c0_i32 = arith.constant 0 : i32
    %0 = arith.cmpi eq, %arg1, %c0_i32 : i32
    %1 = arith.extui %0 : i1 to i32
    %c0_i32_0 = arith.constant 0 : i32
    %2 = arith.cmpi ne, %1, %c0_i32_0 : i32
    scf.if %2 {
      %c0_71 = arith.constant 0 : index
      %c0_72 = arith.constant 0 : index
      %c0_73 = arith.constant 0 : index
      %167 = vector.load %arg2[%c0_71, %c0_72, %c0_73] : memref<2x8x32xf32, #tpu.memory_space<vmem>>, vector<2x8x32xf32>
      %168 = vector.shape_cast %167 : vector<2x8x32xf32> to vector<16x32xf32>
      %c0_74 = arith.constant 0 : index
      %c0_75 = arith.constant 0 : index
      %169 = vector.load %arg16[%c0_74, %c0_75] : memref<16x32xf32, #tpu.memory_space<vmem>>, vector<16x32xf32>
      tpu.vector_store %arg16[%c0_74, %c0_75], %168 {strides = array<i32>} : memref<16x32xf32, #tpu.memory_space<vmem>>, vector<16x32xf32>,
    } else {
    }
    %c0 = arith.constant 0 : index
    %c0_1 = arith.constant 0 : index
    %3 = vector.load %arg16[%c0, %c0_1] : memref<16x32xf32, #tpu.memory_space<vmem>>, vector<16x32xf32>
    %c0_2 = arith.constant 0 : index
    %c0_3 = arith.constant 0 : index
    %c0_4 = arith.constant 0 : index
    %4 = vector.load %arg3[%c0_2, %c0_3, %c0_4] : memref<1x32x96xf32, #tpu.memory_space<vmem>>, vector<1x32x96xf32>
    %5 = vector.shape_cast %4 : vector<1x32x96xf32> to vector<32x96xf32>
    %c0_5 = arith.constant 0 : index
    %c0_6 = arith.constant 0 : index
    %c0_7 = arith.constant 0 : index
    %6 = vector.load %arg4[%c0_5, %c0_6, %c0_7] : memref<1x1x96xf32, #tpu.memory_space<vmem>>, vector<1x1x96xf32>
    %7 = vector.shape_cast %6 : vector<1x1x96xf32> to vector<1x96xf32>
    %c0_8 = arith.constant 0 : index
    %c0_9 = arith.constant 0 : index
    %c0_10 = arith.constant 0 : index
    %8 = vector.load %arg5[%c0_8, %c0_9, %c0_10] : memref<1x32x32xf32, #tpu.memory_space<vmem>>, vector<1x32x32xf32>
    %9 = vector.shape_cast %8 : vector<1x32x32xf32> to vector<32x32xf32>
    %c0_11 = arith.constant 0 : index
    %c0_12 = arith.constant 0 : index
    %c0_13 = arith.constant 0 : index
    %10 = vector.load %arg6[%c0_11, %c0_12, %c0_13] : memref<1x1x32xf32, #tpu.memory_space<vmem>>, vector<1x1x32xf32>
    %11 = vector.shape_cast %10 : vector<1x1x32xf32> to vector<1x32xf32>
    %c0_14 = arith.constant 0 : index
    %c0_15 = arith.constant 0 : index
    %c0_16 = arith.constant 0 : index
    %12 = vector.load %arg7[%c0_14, %c0_15, %c0_16] : memref<1x1x32xf32, #tpu.memory_space<vmem>>, vector<1x1x32xf32>
    %13 = vector.shape_cast %12 : vector<1x1x32xf32> to vector<1x32xf32>
    %c0_17 = arith.constant 0 : index
    %c0_18 = arith.constant 0 : index
    %c0_19 = arith.constant 0 : index
    %14 = vector.load %arg8[%c0_17, %c0_18, %c0_19] : memref<1x1x32xf32, #tpu.memory_space<vmem>>, vector<1x1x32xf32>
    %15 = vector.shape_cast %14 : vector<1x1x32xf32> to vector<1x32xf32>
    %c0_20 = arith.constant 0 : index
    %c0_21 = arith.constant 0 : index
    %c0_22 = arith.constant 0 : index
    %16 = vector.load %arg9[%c0_20, %c0_21, %c0_22] : memref<1x32x32xf32, #tpu.memory_space<vmem>>, vector<1x32x32xf32>
    %17 = vector.shape_cast %16 : vector<1x32x32xf32> to vector<32x32xf32>
    %c0_23 = arith.constant 0 : index
    %c0_24 = arith.constant 0 : index
    %c0_25 = arith.constant 0 : index
    %18 = vector.load %arg10[%c0_23, %c0_24, %c0_25] : memref<1x1x32xf32, #tpu.memory_space<vmem>>, vector<1x1x32xf32>
    %19 = vector.shape_cast %18 : vector<1x1x32xf32> to vector<1x32xf32>
    %c0_26 = arith.constant 0 : index
    %c0_27 = arith.constant 0 : index
    %c0_28 = arith.constant 0 : index
    %20 = vector.load %arg11[%c0_26, %c0_27, %c0_28] : memref<1x32x32xf32, #tpu.memory_space<vmem>>, vector<1x32x32xf32>
    %21 = vector.shape_cast %20 : vector<1x32x32xf32> to vector<32x32xf32>
    %c0_29 = arith.constant 0 : index
    %c0_30 = arith.constant 0 : index
    %c0_31 = arith.constant 0 : index
    %22 = vector.load %arg12[%c0_29, %c0_30, %c0_31] : memref<1x1x32xf32, #tpu.memory_space<vmem>>, vector<1x1x32xf32>
    %23 = vector.shape_cast %22 : vector<1x1x32xf32> to vector<1x32xf32>
    %c0_32 = arith.constant 0 : index
    %c0_33 = arith.constant 0 : index
    %c0_34 = arith.constant 0 : index
    %24 = vector.load %arg13[%c0_32, %c0_33, %c0_34] : memref<1x1x32xf32, #tpu.memory_space<vmem>>, vector<1x1x32xf32>
    %25 = vector.shape_cast %24 : vector<1x1x32xf32> to vector<1x32xf32>
    %c0_35 = arith.constant 0 : index
    %c0_36 = arith.constant 0 : index
    %c0_37 = arith.constant 0 : index
    %26 = vector.load %arg14[%c0_35, %c0_36, %c0_37] : memref<1x1x32xf32, #tpu.memory_space<vmem>>, vector<1x1x32xf32>
    %27 = vector.shape_cast %26 : vector<1x1x32xf32> to vector<1x32xf32>
    %cst = arith.constant dense<0.000000e+00> : vector<16x96xf32>
    %28 = tpu.matmul %3, %5, %cst {dimension_numbers = #tpu.dot_dimension_numbers<[1], [0], [0], [1], [0, 0, 1, 1], [], []>} : vector<16x32xf32>, vector<32x96xf32>, vector<16x96xf32> -> vector<16x96xf32>
    %29 = vector.broadcast %7 : vector<1x96xf32> to vector<16x96xf32>
    %30 = arith.addf %28, %29 : vector<16x96xf32>
    %31 = vector.extract_strided_slice %30 {offsets = [0, 0], sizes = [16, 8], strides = [1, 1]} : vector<16x96xf32> to vector<16x8xf32>
    %32 = vector.shape_cast %31 : vector<16x8xf32> to vector<2x8x8xf32>
    %33 = vector.extract_strided_slice %30 {offsets = [0, 32], sizes = [16, 8], strides = [1, 1]} : vector<16x96xf32> to vector<16x8xf32>
    %34 = vector.shape_cast %33 : vector<16x8xf32> to vector<2x8x8xf32>
    %35 = vector.extract_strided_slice %30 {offsets = [0, 64], sizes = [16, 8], strides = [1, 1]} : vector<16x96xf32> to vector<16x8xf32>
    %36 = vector.shape_cast %35 : vector<16x8xf32> to vector<2x8x8xf32>
    "tpu.trace_start"() <{level = 10 : i32, message = "bqd,bkd->bqk"}> : () -> ()
    %cst_38 = arith.constant dense<0.000000e+00> : vector<2x8x8xf32>
    %37 = tpu.matmul %32, %34, %cst_38 {dimension_numbers = #tpu.dot_dimension_numbers<[2], [2], [1], [1], [0, 0, 0, 1, 1, 1], [0], [0]>} : vector<2x8x8xf32>, vector<2x8x8xf32>, vector<2x8x8xf32> -> vector<2x8x8xf32>
    "tpu.trace_stop"() : () -> ()
    %cst_39 = arith.constant dense<0xFF800000> : vector<2x8xf32>
    %38 = vector.multi_reduction <maximumf>, %37, %cst_39 [2] : vector<2x8x8xf32> to vector<2x8xf32>
    %39 = vector.shape_cast %38 : vector<2x8xf32> to vector<2x8x1xf32>
    %40 = vector.broadcast %39 : vector<2x8x1xf32> to vector<2x8x8xf32>
    %41 = arith.subf %37, %40 : vector<2x8x8xf32>
    %42 = math.exp %41 : vector<2x8x8xf32>
    %cst_40 = arith.constant dense<0.000000e+00> : vector<2x8xf32>
    %43 = vector.multi_reduction <add>, %42, %cst_40 [2] : vector<2x8x8xf32> to vector<2x8xf32>
    %44 = vector.shape_cast %43 : vector<2x8xf32> to vector<2x8x1xf32>
    %45 = tpu.reciprocal %44 {approx = true} : vector<2x8x1xf32> -> vector<2x8x1xf32>
    %46 = vector.broadcast %45 : vector<2x8x1xf32> to vector<2x8x8xf32>
    %47 = arith.mulf %42, %46 : vector<2x8x8xf32>
    "tpu.trace_start"() <{level = 10 : i32, message = "bqk,bkd->bqd"}> : () -> ()
    %cst_41 = arith.constant dense<0.000000e+00> : vector<2x8x8xf32>
    %48 = tpu.matmul %47, %36, %cst_41 {dimension_numbers = #tpu.dot_dimension_numbers<[2], [1], [1], [2], [0, 0, 0, 1, 1, 2], [0], [0]>} : vector<2x8x8xf32>, vector<2x8x8xf32>, vector<2x8x8xf32> -> vector<2x8x8xf32>
    "tpu.trace_stop"() : () -> ()
    %49 = vector.extract_strided_slice %30 {offsets = [0, 8], sizes = [16, 8], strides = [1, 1]} : vector<16x96xf32> to vector<16x8xf32>
    %50 = vector.shape_cast %49 : vector<16x8xf32> to vector<2x8x8xf32>
    %51 = vector.extract_strided_slice %30 {offsets = [0, 40], sizes = [16, 8], strides = [1, 1]} : vector<16x96xf32> to vector<16x8xf32>
    %52 = vector.shape_cast %51 : vector<16x8xf32> to vector<2x8x8xf32>
    %53 = vector.extract_strided_slice %30 {offsets = [0, 72], sizes = [16, 8], strides = [1, 1]} : vector<16x96xf32> to vector<16x8xf32>
    %54 = vector.shape_cast %53 : vector<16x8xf32> to vector<2x8x8xf32>
    "tpu.trace_start"() <{level = 10 : i32, message = "bqd,bkd->bqk"}> : () -> ()
    %cst_42 = arith.constant dense<0.000000e+00> : vector<2x8x8xf32>
    %55 = tpu.matmul %50, %52, %cst_42 {dimension_numbers = #tpu.dot_dimension_numbers<[2], [2], [1], [1], [0, 0, 0, 1, 1, 1], [0], [0]>} : vector<2x8x8xf32>, vector<2x8x8xf32>, vector<2x8x8xf32> -> vector<2x8x8xf32>
    "tpu.trace_stop"() : () -> ()
    %cst_43 = arith.constant dense<0xFF800000> : vector<2x8xf32>
    %56 = vector.multi_reduction <maximumf>, %55, %cst_43 [2] : vector<2x8x8xf32> to vector<2x8xf32>
    %57 = vector.shape_cast %56 : vector<2x8xf32> to vector<2x8x1xf32>
    %58 = vector.broadcast %57 : vector<2x8x1xf32> to vector<2x8x8xf32>
    %59 = arith.subf %55, %58 : vector<2x8x8xf32>
    %60 = math.exp %59 : vector<2x8x8xf32>
    %cst_44 = arith.constant dense<0.000000e+00> : vector<2x8xf32>
    %61 = vector.multi_reduction <add>, %60, %cst_44 [2] : vector<2x8x8xf32> to vector<2x8xf32>
    %62 = vector.shape_cast %61 : vector<2x8xf32> to vector<2x8x1xf32>
    %63 = tpu.reciprocal %62 {approx = true} : vector<2x8x1xf32> -> vector<2x8x1xf32>
    %64 = vector.broadcast %63 : vector<2x8x1xf32> to vector<2x8x8xf32>
    %65 = arith.mulf %60, %64 : vector<2x8x8xf32>
    "tpu.trace_start"() <{level = 10 : i32, message = "bqk,bkd->bqd"}> : () -> ()
    %cst_45 = arith.constant dense<0.000000e+00> : vector<2x8x8xf32>
    %66 = tpu.matmul %65, %54, %cst_45 {dimension_numbers = #tpu.dot_dimension_numbers<[2], [1], [1], [2], [0, 0, 0, 1, 1, 2], [0], [0]>} : vector<2x8x8xf32>, vector<2x8x8xf32>, vector<2x8x8xf32> -> vector<2x8x8xf32>
    "tpu.trace_stop"() : () -> ()
    %67 = vector.extract_strided_slice %30 {offsets = [0, 16], sizes = [16, 8], strides = [1, 1]} : vector<16x96xf32> to vector<16x8xf32>
    %68 = vector.shape_cast %67 : vector<16x8xf32> to vector<2x8x8xf32>
    %69 = vector.extract_strided_slice %30 {offsets = [0, 48], sizes = [16, 8], strides = [1, 1]} : vector<16x96xf32> to vector<16x8xf32>
    %70 = vector.shape_cast %69 : vector<16x8xf32> to vector<2x8x8xf32>
    %71 = vector.extract_strided_slice %30 {offsets = [0, 80], sizes = [16, 8], strides = [1, 1]} : vector<16x96xf32> to vector<16x8xf32>
    %72 = vector.shape_cast %71 : vector<16x8xf32> to vector<2x8x8xf32>
    "tpu.trace_start"() <{level = 10 : i32, message = "bqd,bkd->bqk"}> : () -> ()
    %cst_46 = arith.constant dense<0.000000e+00> : vector<2x8x8xf32>
    %73 = tpu.matmul %68, %70, %cst_46 {dimension_numbers = #tpu.dot_dimension_numbers<[2], [2], [1], [1], [0, 0, 0, 1, 1, 1], [0], [0]>} : vector<2x8x8xf32>, vector<2x8x8xf32>, vector<2x8x8xf32> -> vector<2x8x8xf32>
    "tpu.trace_stop"() : () -> ()
    %cst_47 = arith.constant dense<0xFF800000> : vector<2x8xf32>
    %74 = vector.multi_reduction <maximumf>, %73, %cst_47 [2] : vector<2x8x8xf32> to vector<2x8xf32>
    %75 = vector.shape_cast %74 : vector<2x8xf32> to vector<2x8x1xf32>
    %76 = vector.broadcast %75 : vector<2x8x1xf32> to vector<2x8x8xf32>
    %77 = arith.subf %73, %76 : vector<2x8x8xf32>
    %78 = math.exp %77 : vector<2x8x8xf32>
    %cst_48 = arith.constant dense<0.000000e+00> : vector<2x8xf32>
    %79 = vector.multi_reduction <add>, %78, %cst_48 [2] : vector<2x8x8xf32> to vector<2x8xf32>
    %80 = vector.shape_cast %79 : vector<2x8xf32> to vector<2x8x1xf32>
    %81 = tpu.reciprocal %80 {approx = true} : vector<2x8x1xf32> -> vector<2x8x1xf32>
    %82 = vector.broadcast %81 : vector<2x8x1xf32> to vector<2x8x8xf32>
    %83 = arith.mulf %78, %82 : vector<2x8x8xf32>
    "tpu.trace_start"() <{level = 10 : i32, message = "bqk,bkd->bqd"}> : () -> ()
    %cst_49 = arith.constant dense<0.000000e+00> : vector<2x8x8xf32>
    %84 = tpu.matmul %83, %72, %cst_49 {dimension_numbers = #tpu.dot_dimension_numbers<[2], [1], [1], [2], [0, 0, 0, 1, 1, 2], [0], [0]>} : vector<2x8x8xf32>, vector<2x8x8xf32>, vector<2x8x8xf32> -> vector<2x8x8xf32>
    "tpu.trace_stop"() : () -> ()
    %85 = vector.extract_strided_slice %30 {offsets = [0, 24], sizes = [16, 8], strides = [1, 1]} : vector<16x96xf32> to vector<16x8xf32>
    %86 = vector.shape_cast %85 : vector<16x8xf32> to vector<2x8x8xf32>
    %87 = vector.extract_strided_slice %30 {offsets = [0, 56], sizes = [16, 8], strides = [1, 1]} : vector<16x96xf32> to vector<16x8xf32>
    %88 = vector.shape_cast %87 : vector<16x8xf32> to vector<2x8x8xf32>
    %89 = vector.extract_strided_slice %30 {offsets = [0, 88], sizes = [16, 8], strides = [1, 1]} : vector<16x96xf32> to vector<16x8xf32>
    %90 = vector.shape_cast %89 : vector<16x8xf32> to vector<2x8x8xf32>
    "tpu.trace_start"() <{level = 10 : i32, message = "bqd,bkd->bqk"}> : () -> ()
    %cst_50 = arith.constant dense<0.000000e+00> : vector<2x8x8xf32>
    %91 = tpu.matmul %86, %88, %cst_50 {dimension_numbers = #tpu.dot_dimension_numbers<[2], [2], [1], [1], [0, 0, 0, 1, 1, 1], [0], [0]>} : vector<2x8x8xf32>, vector<2x8x8xf32>, vector<2x8x8xf32> -> vector<2x8x8xf32>
    "tpu.trace_stop"() : () -> ()
    %cst_51 = arith.constant dense<0xFF800000> : vector<2x8xf32>
    %92 = vector.multi_reduction <maximumf>, %91, %cst_51 [2] : vector<2x8x8xf32> to vector<2x8xf32>
    %93 = vector.shape_cast %92 : vector<2x8xf32> to vector<2x8x1xf32>
    %94 = vector.broadcast %93 : vector<2x8x1xf32> to vector<2x8x8xf32>
    %95 = arith.subf %91, %94 : vector<2x8x8xf32>
    %96 = math.exp %95 : vector<2x8x8xf32>
    %cst_52 = arith.constant dense<0.000000e+00> : vector<2x8xf32>
    %97 = vector.multi_reduction <add>, %96, %cst_52 [2] : vector<2x8x8xf32> to vector<2x8xf32>
    %98 = vector.shape_cast %97 : vector<2x8xf32> to vector<2x8x1xf32>
    %99 = tpu.reciprocal %98 {approx = true} : vector<2x8x1xf32> -> vector<2x8x1xf32>
    %100 = vector.broadcast %99 : vector<2x8x1xf32> to vector<2x8x8xf32>
    %101 = arith.mulf %96, %100 : vector<2x8x8xf32>
    "tpu.trace_start"() <{level = 10 : i32, message = "bqk,bkd->bqd"}> : () -> ()
    %cst_53 = arith.constant dense<0.000000e+00> : vector<2x8x8xf32>
    %102 = tpu.matmul %101, %90, %cst_53 {dimension_numbers = #tpu.dot_dimension_numbers<[2], [1], [1], [2], [0, 0, 0, 1, 1, 2], [0], [0]>} : vector<2x8x8xf32>, vector<2x8x8xf32>, vector<2x8x8xf32> -> vector<2x8x8xf32>
    "tpu.trace_stop"() : () -> ()
    %103 = tpu.concatenate %48, %66, %84, %102 in 2 : vector<2x8x8xf32>, vector<2x8x8xf32>, vector<2x8x8xf32>, vector<2x8x8xf32> -> vector<2x8x32xf32>
    %104 = vector.shape_cast %103 : vector<2x8x32xf32> to vector<16x32xf32>
    %cst_54 = arith.constant dense<0.000000e+00> : vector<16x32xf32>
    %105 = tpu.matmul %104, %9, %cst_54 {dimension_numbers = #tpu.dot_dimension_numbers<[1], [0], [0], [1], [0, 0, 1, 1], [], []>} : vector<16x32xf32>, vector<32x32xf32>, vector<16x32xf32> -> vector<16x32xf32>
    %106 = vector.broadcast %11 : vector<1x32xf32> to vector<16x32xf32>
    %107 = arith.addf %105, %106 : vector<16x32xf32>
    %108 = arith.addf %107, %3 : vector<16x32xf32>
    %cst_55 = arith.constant dense<0.000000e+00> : vector<16xf32>
    %109 = vector.multi_reduction <add>, %108, %cst_55 [1] : vector<16x32xf32> to vector<16xf32>
    %110 = vector.shape_cast %109 : vector<16xf32> to vector<16x1xf32>
    %cst_56 = arith.constant 3.200000e+01 : f32
    %111 = vector.broadcast %cst_56 : f32 to vector<16x1xf32>
    %112 = arith.divf %110, %111 : vector<16x1xf32>
    %113 = vector.broadcast %112 : vector<16x1xf32> to vector<16x32xf32>
    %114 = arith.subf %108, %113 : vector<16x32xf32>
    %115 = arith.mulf %114, %114 : vector<16x32xf32>
    %cst_57 = arith.constant dense<0.000000e+00> : vector<16xf32>
    %116 = vector.multi_reduction <add>, %115, %cst_57 [1] : vector<16x32xf32> to vector<16xf32>
    %117 = vector.shape_cast %116 : vector<16xf32> to vector<16x1xf32>
    %cst_58 = arith.constant 3.200000e+01 : f32
    %118 = vector.broadcast %cst_58 : f32 to vector<16x1xf32>
    %119 = arith.divf %117, %118 : vector<16x1xf32>
    %120 = vector.broadcast %112 : vector<16x1xf32> to vector<16x32xf32>
    %121 = arith.subf %108, %120 : vector<16x32xf32>
    %cst_59 = arith.constant 9.99999974E-6 : f32
    %122 = vector.broadcast %cst_59 : f32 to vector<16x1xf32>
    %123 = arith.addf %119, %122 : vector<16x1xf32>
    %124 = math.rsqrt %123 : vector<16x1xf32>
    %125 = vector.broadcast %124 : vector<16x1xf32> to vector<16x32xf32>
    %126 = arith.mulf %121, %125 : vector<16x32xf32>
    %127 = vector.broadcast %13 : vector<1x32xf32> to vector<16x32xf32>
    %128 = arith.mulf %126, %127 : vector<16x32xf32>
    %129 = vector.broadcast %15 : vector<1x32xf32> to vector<16x32xf32>
    %130 = arith.addf %128, %129 : vector<16x32xf32>
    %cst_60 = arith.constant dense<0.000000e+00> : vector<16x32xf32>
    %131 = tpu.matmul %130, %17, %cst_60 {dimension_numbers = #tpu.dot_dimension_numbers<[1], [0], [0], [1], [0, 0, 1, 1], [], []>} : vector<16x32xf32>, vector<32x32xf32>, vector<16x32xf32> -> vector<16x32xf32>
    %132 = vector.broadcast %19 : vector<1x32xf32> to vector<16x32xf32>
    %133 = arith.addf %131, %132 : vector<16x32xf32>
    %cst_61 = arith.constant 0.00999999977 : f32
    %134 = vector.broadcast %cst_61 : f32 to vector<16x32xf32>
    %135 = arith.mulf %134, %133 : vector<16x32xf32>
    %136 = arith.maximumf %133, %135 : vector<16x32xf32>
    %cst_62 = arith.constant dense<0.000000e+00> : vector<16x32xf32>
    %137 = tpu.matmul %136, %21, %cst_62 {dimension_numbers = #tpu.dot_dimension_numbers<[1], [0], [0], [1], [0, 0, 1, 1], [], []>} : vector<16x32xf32>, vector<32x32xf32>, vector<16x32xf32> -> vector<16x32xf32>
    %138 = vector.broadcast %23 : vector<1x32xf32> to vector<16x32xf32>
    %139 = arith.addf %137, %138 : vector<16x32xf32>
    %140 = arith.addf %139, %130 : vector<16x32xf32>
    %cst_63 = arith.constant dense<0.000000e+00> : vector<16xf32>
    %141 = vector.multi_reduction <add>, %140, %cst_63 [1] : vector<16x32xf32> to vector<16xf32>
    %142 = vector.shape_cast %141 : vector<16xf32> to vector<16x1xf32>
    %cst_64 = arith.constant 3.200000e+01 : f32
    %143 = vector.broadcast %cst_64 : f32 to vector<16x1xf32>
    %144 = arith.divf %142, %143 : vector<16x1xf32>
    %145 = vector.broadcast %144 : vector<16x1xf32> to vector<16x32xf32>
    %146 = arith.subf %140, %145 : vector<16x32xf32>
    %147 = arith.mulf %146, %146 : vector<16x32xf32>
    %cst_65 = arith.constant dense<0.000000e+00> : vector<16xf32>
    %148 = vector.multi_reduction <add>, %147, %cst_65 [1] : vector<16x32xf32> to vector<16xf32>
    %149 = vector.shape_cast %148 : vector<16xf32> to vector<16x1xf32>
    %cst_66 = arith.constant 3.200000e+01 : f32
    %150 = vector.broadcast %cst_66 : f32 to vector<16x1xf32>
    %151 = arith.divf %149, %150 : vector<16x1xf32>
    %152 = vector.broadcast %144 : vector<16x1xf32> to vector<16x32xf32>
    %153 = arith.subf %140, %152 : vector<16x32xf32>
    %cst_67 = arith.constant 9.99999974E-6 : f32
    %154 = vector.broadcast %cst_67 : f32 to vector<16x1xf32>
    %155 = arith.addf %151, %154 : vector<16x1xf32>
    %156 = math.rsqrt %155 : vector<16x1xf32>
    %157 = vector.broadcast %156 : vector<16x1xf32> to vector<16x32xf32>
    %158 = arith.mulf %153, %157 : vector<16x32xf32>
    %159 = vector.broadcast %25 : vector<1x32xf32> to vector<16x32xf32>
    %160 = arith.mulf %158, %159 : vector<16x32xf32>
    %161 = vector.broadcast %27 : vector<1x32xf32> to vector<16x32xf32>
    %162 = arith.addf %160, %161 : vector<16x32xf32>
    %c0_68 = arith.constant 0 : index
    %c0_69 = arith.constant 0 : index
    %163 = vector.load %arg16[%c0_68, %c0_69] : memref<16x32xf32, #tpu.memory_space<vmem>>, vector<16x32xf32>
    tpu.vector_store %arg16[%c0_68, %c0_69], %162 {strides = array<i32>} : memref<16x32xf32, #tpu.memory_space<vmem>>, vector<16x32xf32>,
    %c1_i32 = arith.constant 1 : i32
    %164 = arith.cmpi eq, %arg1, %c1_i32 : i32
    %165 = arith.extui %164 : i1 to i32
    %c0_i32_70 = arith.constant 0 : i32
    %166 = arith.cmpi ne, %165, %c0_i32_70 : i32
    scf.if %166 {
      %167 = vector.shape_cast %162 : vector<16x32xf32> to vector<2x8x32xf32>
      %c0_71 = arith.constant 0 : index
      %c0_72 = arith.constant 0 : index
      %c0_73 = arith.constant 0 : index
      %168 = vector.load %arg15[%c0_71, %c0_72, %c0_73] : memref<2x8x32xf32, #tpu.memory_space<vmem>>, vector<2x8x32xf32>
      tpu.vector_store %arg15[%c0_71, %c0_72, %c0_73], %167 {strides = array<i32>} : memref<2x8x32xf32, #tpu.memory_space<vmem>>, vector<2x8x32xf32>,
    } else {
    }
    return
  }
  func.func @transform_0(%arg0: i32, %arg1: i32) -> (i32, i32, i32) {
    %c0_i32 = arith.constant 0 : i32
    %c0_i32_0 = arith.constant 0 : i32
    %c0_i32_1 = arith.constant 0 : i32
    return %arg0, %c0_i32, %c0_i32_0 : i32, i32, i32
  }
  func.func @transform_1(%arg0: i32, %arg1: i32) -> (i32, i32, i32) {
    %c0_i32 = arith.constant 0 : i32
    %c0_i32_0 = arith.constant 0 : i32
    %c0_i32_1 = arith.constant 0 : i32
    return %arg1, %c0_i32, %c0_i32_0 : i32, i32, i32
  }
  func.func @transform_2(%arg0: i32, %arg1: i32) -> (i32, i32, i32) {
    %c0_i32 = arith.constant 0 : i32
    %c0_i32_0 = arith.constant 0 : i32
    %c0_i32_1 = arith.constant 0 : i32
    return %arg1, %c0_i32, %c0_i32_0 : i32, i32, i32
  }
  func.func @transform_3(%arg0: i32, %arg1: i32) -> (i32, i32, i32) {
    %c0_i32 = arith.constant 0 : i32
    %c0_i32_0 = arith.constant 0 : i32
    %c0_i32_1 = arith.constant 0 : i32
    return %arg1, %c0_i32, %c0_i32_0 : i32, i32, i32
  }
  func.func @transform_4(%arg0: i32, %arg1: i32) -> (i32, i32, i32) {
    %c0_i32 = arith.constant 0 : i32
    %c0_i32_0 = arith.constant 0 : i32
    %c0_i32_1 = arith.constant 0 : i32
    return %arg1, %c0_i32, %c0_i32_0 : i32, i32, i32
  }
  func.func @transform_5(%arg0: i32, %arg1: i32) -> (i32, i32, i32) {
    %c0_i32 = arith.constant 0 : i32
    %c0_i32_0 = arith.constant 0 : i32
    %c0_i32_1 = arith.constant 0 : i32
    return %arg1, %c0_i32, %c0_i32_0 : i32, i32, i32
  }
  func.func @transform_6(%arg0: i32, %arg1: i32) -> (i32, i32, i32) {
    %c0_i32 = arith.constant 0 : i32
    %c0_i32_0 = arith.constant 0 : i32
    %c0_i32_1 = arith.constant 0 : i32
    return %arg1, %c0_i32, %c0_i32_0 : i32, i32, i32
  }
  func.func @transform_7(%arg0: i32, %arg1: i32) -> (i32, i32, i32) {
    %c0_i32 = arith.constant 0 : i32
    %c0_i32_0 = arith.constant 0 : i32
    %c0_i32_1 = arith.constant 0 : i32
    return %arg1, %c0_i32, %c0_i32_0 : i32, i32, i32
  }
  func.func @transform_8(%arg0: i32, %arg1: i32) -> (i32, i32, i32) {
    %c0_i32 = arith.constant 0 : i32
    %c0_i32_0 = arith.constant 0 : i32
    %c0_i32_1 = arith.constant 0 : i32
    return %arg1, %c0_i32, %c0_i32_0 : i32, i32, i32
  }
  func.func @transform_9(%arg0: i32, %arg1: i32) -> (i32, i32, i32) {
    %c0_i32 = arith.constant 0 : i32
    %c0_i32_0 = arith.constant 0 : i32
    %c0_i32_1 = arith.constant 0 : i32
    return %arg1, %c0_i32, %c0_i32_0 : i32, i32, i32
  }
  func.func @transform_10(%arg0: i32, %arg1: i32) -> (i32, i32, i32) {
    %c0_i32 = arith.constant 0 : i32
    %c0_i32_0 = arith.constant 0 : i32
    %c0_i32_1 = arith.constant 0 : i32
    return %arg1, %c0_i32, %c0_i32_0 : i32, i32, i32
  }
  func.func @transform_11(%arg0: i32, %arg1: i32) -> (i32, i32, i32) {
    %c0_i32 = arith.constant 0 : i32
    %c0_i32_0 = arith.constant 0 : i32
    %c0_i32_1 = arith.constant 0 : i32
    return %arg1, %c0_i32, %c0_i32_0 : i32, i32, i32
  }
  func.func @transform_12(%arg0: i32, %arg1: i32) -> (i32, i32, i32) {
    %c0_i32 = arith.constant 0 : i32
    %c0_i32_0 = arith.constant 0 : i32
    %c0_i32_1 = arith.constant 0 : i32
    return %arg1, %c0_i32, %c0_i32_0 : i32, i32, i32
  }
  func.func @transform_13(%arg0: i32, %arg1: i32) -> (i32, i32, i32) {
    %c0_i32 = arith.constant 0 : i32
    %c0_i32_0 = arith.constant 0 : i32
    %c0_i32_1 = arith.constant 0 : i32
    return %arg0, %c0_i32, %c0_i32_0 : i32, i32, i32
  }
}

</mosaic_0001>

<bundles_post_ra>
// kernel: tpu_custom_call.1
= control target key start
LH: loop header
LB: loop body
LE: loop exit
PB: predicated region body
PF: predicated region fallthrough
CT: control target
= control target key end

     0   :  { %s3981_s0 = inlined_call_operand.hbm [shape: f32[2,8,32], index: 0, kind: input, shape index: {}]   ;;  %s3982_s1 = inlined_call_operand.hbm [shape: f32[2,32,96], index: 1, kind: input, shape index: {}]   ;;  %s3983_s2 = inlined_call_operand.vmem [shape: f32[2,1,96], index: 2, kind: input, shape index: {}]   ;;  %s3984_s3 = inlined_call_operand.hbm [shape: f32[2,32,32], index: 3, kind: input, shape index: {}]   ;;  %s3985_s4 = inlined_call_operand.vmem [shape: f32[2,1,32], index: 4, kind: input, shape index: {}]   ;;  %s3986_s5 = inlined_call_operand.vmem [shape: f32[2,1,32], index: 5, kind: input, shape index: {}]   ;;  %s3987_s6 = inlined_call_operand.vmem [shape: f32[2,1,32], index: 6, kind: input, shape index: {}]   ;;  %s3988_s7 = inlined_call_operand.hbm [shape: f32[2,32,32], index: 7, kind: input, shape index: {}]   ;;  %s3989_s8 = inlined_call_operand.vmem [shape: f32[2,1,32], index: 8, kind: input, shape index: {}]   ;;  %s3990_s9 = inlined_call_operand.hbm [shape: f32[2,32,32], index: 9, kind: input, shape index: {}]   ;;  %s3991_s10 = inlined_call_operand.vmem [shape: f32[2,1,32], index: 10, kind: input, shape index: {}]   ;;  %s3992_s11 = inlined_call_operand.vmem [shape: f32[2,1,32], index: 11, kind: input, shape index: {}]   ;;  %s3993_s12 = inlined_call_operand.vmem [shape: f32[2,1,32], index: 12, kind: input, shape index: {}]   ;;  %s3994_s13 = inlined_call_operand.hbm [shape: f32[2,8,32], index: 13, kind: output, shape index: {}]  }
   0x1   :  { %4004 = sst [smem:[#allocation23_spill]] %s3981_s0 }
   0x2   :  { %4005 = sst [smem:[#allocation24_spill]] %s3982_s1 }
   0x3   :  { %4006 = sst [smem:[#allocation25_spill]] %s3984_s3 }
   0x4   :  { %4007 = sst [smem:[#allocation26_spill]] %s3988_s7 }
   0x5   :  { %4008 = sst [smem:[#allocation27_spill]] %s3990_s9 }
   0x6   :  { %4009 = sst [smem:[#allocation28_spill]] %s3992_s11 }
   0x7   :  { %4010 = sst [smem:[#allocation29_spill]] %s3993_s12 }
   0x8   :  { %4011 = sst [smem:[#allocation30_spill]] %s3994_s13 }
   0x9   :  { %18 = vsyncpa [#allocation4], 0 }
   0xa   :  { %19 = vsyncpa [#allocation7], 0 }
   0xb   :  { %21 = vsyncpa [#allocation7 + $0x1], 0 }
   0xc   :  { %22 = vsyncpa [#allocation10], 0 }
   0xd   :  { %24 = vsyncpa [#allocation10 + $0x1], 0 }
   0xe   :  { %25 = vsyncpa [#allocation5], 0  ;;  %s3493_s25 = smov 0   ;;  %s3495_s26 = smov 0  }
   0xf   :  { %s3497_s27 = smov 0   ;;  %s3499_s28 = smov 0  }
  0x10   :  { %s3501_s29 = smov 0   ;;  %s3503_s30 = smov 0  }
  0x11 LB: > { %4012 = sst [smem:[#allocation17_spill]] %s3380_s26  ;;  %s40_s14 = sadd.s32 1, %s3392_s29  ;;  %s3396_s30 = sphi %s3503_s30, %s31_s30   ;;  %s3392_s29 = sphi %s3501_s29, %s4046_s29   ;;  %s3388_s28 = sphi %s3499_s28, %s4045_s28   ;;  %s3384_s27 = sphi %s3497_s27, %s4044_s27   ;;  %s3380_s26 = sphi %s3495_s26, %s4043_s26   ;;  %s3376_s25 = sphi %s3493_s25, %s4042_s25  }
  0x12   : > { %4013 = sst [smem:[#allocation18_spill]] %s3384_s27  ;;  %s76_s15 = sadd.s32 1, %s3384_s27 }
  0x13   : > { %4014 = sst [smem:[#allocation19_spill]] %s3392_s29  ;;  %p41_p0 = scmp.ge.s32.totalorder %s40_s14, 2 }
  0x14   : > { %4015 = sst [smem:[#allocation20_spill]] %s3396_s30  ;;  %p83_p1 = scmp.ne.s32.totalorder %s3384_s27, %s3380_s26 }
  0x15   : > { %p84_p2 = scmp.eq.s32.totalorder %s3396_s30, 0  ;;  %s4048_s14 = smov (%p41_p0, %s40_s14), 0 }
  0x16   : > { %4016 = sst [smem:[#allocation21_spill]] %s4048_s14  ;;  %s73_s17 = ssub.s32 %s3392_s29, %s4048_s14 }
  0x17   : > { %p3530_p3 = por %p84_p2, %p83_p1  ;;  %p74_p4 = scmp.eq.s32.totalorder %s73_s17, 0 }
  0x18   : > { %p3059_p5 = scmp.lt.s32.totalorder %s3396_s30, 2  ;;  %s443_s19 = sand.u32 1, %s3384_s27  }
  0x19   : > { %s3540_s20 = scalar_select %p74_p4, %s3384_s27, %s76_s15  }
  0x1a   : > { %s3542_s21 = sshll.u32 %s443_s19, 5  ;;  %s3545_s22 = sshll.u32 %s3392_s29, 9 }
  0x1b   : > { %4018 = sst [smem:[#allocation22_spill]] %s3540_s20  ;;  %s445_s12 = scalar_lea.vmem [#allocation6], %s3542_s21 }
  0x1c   : > { %s4019_s1 = sld [smem:[#allocation24_spill]]  ;;  %s452_s11 = sshll.u32 %s445_s12, 4  ;;  %s453_s11 = int_to_ptr.vmem [resolvable:$true] %s452_s11 }
  0x1d   : > { %p3554_p6 = pnand %p3059_p5, %p3530_p3  ;;  %s4021_s7 = sld [smem:[#allocation26_spill]] }
  0x1e   : > { %s4022_s14 = sand.u32 1, %s3396_s30   ;;  %s3185_s23 = scalar_lea.vmem %s453_s11, 512 }
  0x1f   : > { %s3564_s29 = scalar_lea.sflag [#allocation7], %s4022_s14  ;;  %p3174_p7 = pneg %p3554_p6 }
  0x20   : > { %p3186_p8 = scmp.ne.s32.totalorder %s453_s11, %s3185_s23  ;;  %s3398_s12 = smov [#allocation6]  }
  0x21   : > { %s3190_s16 = sshll.u32 %s3398_s12, 4  ;;  %s3191_s16 = int_to_ptr.vmem [resolvable:$false] %s3190_s16 }
  0x22   : > { %s451_s13 = scalar_lea.hbm %s4019_s1, %s3545_s22  ;;  %p3188_p9 = pnand %p3186_p8, %p3174_p7 }
  0x23   : > { %s3192_s24 = scalar_lea.vmem %s3191_s16, 1024  ;;  %p3193_p11 = scmp.lt.s32.totalorder %s453_s11, %s3191_s16 }
  0x24   : > { %p3189_p10 = pneg %p3188_p9  ;;  %p3194_p12 = scmp.lt.s32.totalorder %s3192_s24, %s3185_s23 }
  0x26   : > { %p3195_p13 = por %p3194_p12, %p3193_p11 }
  0x28   : > { %p3196_p0 = pnand %p3195_p13, %p3189_p10 }
  0x2a   : > { %3199 = shalt.err (!%p3196_p0)
}
  0x2b   : > { %s3997_s15 = smov 128   ;;  %s3999_s14 = smov 8  }
  0x2c   : > { %3048 = dma.hbm_to_vmem [thread:$0]  (!%p3554_p6), %s451_s13, 512, %s453_s11, %s3564_s29, %s3997_s15, %s3997_s15, %s3999_s14  }
  0x2d   : > { %s511_s19 = scalar_lea.vmem [#allocation9], %s3542_s21  ;;  %s4023_s16 = sand.u32 1, %s3396_s30  }
  0x2e   : > { %s518_s12 = sshll.u32 %s511_s19, 4  ;;  %s3580_s23 = scalar_lea.sflag [#allocation10], %s4023_s16  ;;  %s519_s12 = int_to_ptr.vmem [resolvable:$true] %s518_s12 }
  0x2f   : > { %s3213_s24 = scalar_lea.vmem %s519_s12, 512  ;;  %s3401_s18 = smov [#allocation9]  }
  0x30   : > { %p3214_p1 = scmp.ne.s32.totalorder %s519_s12, %s3213_s24  ;;  %s3218_s1 = sshll.u32 %s3401_s18, 4  ;;  %s3219_s1 = int_to_ptr.vmem [resolvable:$false] %s3218_s1 }
  0x31   : > { %s3220_s20 = scalar_lea.vmem %s3219_s1, 1024  ;;  %p3221_p4 = scmp.lt.s32.totalorder %s519_s12, %s3219_s1 }
  0x32   : > { %p3216_p2 = pnand %p3214_p1, %p3174_p7  ;;  %p3222_p5 = scmp.lt.s32.totalorder %s3220_s20, %s3213_s24 }
  0x34   : > { %p3217_p3 = pneg %p3216_p2  ;;  %p3223_p8 = por %p3222_p5, %p3221_p4 }
  0x36   : > { %p3224_p9 = pnand %p3223_p8, %p3217_p3 }
  0x38   : > { %3227 = shalt.err (!%p3224_p9)
}
  0x39   : > { %s4024_s19 = scalar_lea.hbm %s4021_s7, %s3545_s22  ;;  %s3597_s1 = sadd.s32 4294967295, %s3396_s30  }
  0x3a   : > { %3054 = dma.hbm_to_vmem [thread:$0]  (!%p3554_p6), %s4024_s19, 512, %s519_s12, %s3580_s23, %s3997_s15, %s3997_s15, %s3999_s14  }
  0x3b   : > { %p89_p10 = scmp.ne.s32.totalorder %s3380_s26, %s3376_s25  ;;  %p90_p11 = scmp.eq.s32.totalorder %s3597_s1, 0 }
  0x3c   : > { %p2774_p12 = scmp.ge.s32.totalorder %s3396_s30, 1  ;;  %p412_p13 = scmp.lt.s32.totalorder %s3396_s30, 3 }
  0x3d   : > { %p3606_p0 = por %p90_p11, %p89_p10  ;;  %s3402_s12 = smov [#allocation3]  }
  0x3e   : > { %p3610_p1 = pnand %p2774_p12, %p412_p13  ;;  %s427_s16 = sshll.u32 %s3402_s12, 4  ;;  %s3614_s16 = int_to_ptr.vmem [resolvable:$true] %s427_s16 }
  0x3f   : > { %s4027_s3 = sld [smem:[#allocation25_spill]]  ;;  %s472_s13 = scalar_lea.vmem [#allocation8], %s3542_s21 }
  0x40   : > { %p3041_p2 = pneg %p3610_p1  ;;  %s479_s19 = sshll.u32 %s472_s13, 4  ;;  %s480_s19 = int_to_ptr.vmem [resolvable:$true] %s479_s19 }
  0x41   : > { %s3241_s14 = scalar_lea.vmem %s480_s19, 512  ;;  %s3403_s12 = smov [#allocation8]  }
  0x42   : > { %p3625_p3 = pnand %p3041_p2, %p90_p11  ;;  %p3242_p4 = scmp.ne.s32.totalorder %s480_s19, %s3241_s14 }
  0x43   : > { %s3246_s7 = sshll.u32 %s3403_s12, 4  ;;  %s3247_s7 = int_to_ptr.vmem [resolvable:$false] %s3246_s7 }
  0x44   : > { %p3244_p5 = pnand %p3242_p4, %p3174_p7  ;;  %s3248_s27 = scalar_lea.vmem %s3247_s7, 1024 }
  0x45   : > { %s478_s11 = scalar_lea.hbm %s4027_s3, %s3545_s22  ;;  %p3249_p9 = scmp.lt.s32.totalorder %s480_s19, %s3247_s7 }
  0x46   : > { %p3245_p8 = pneg %p3244_p5  ;;  %p3250_p10 = scmp.lt.s32.totalorder %s3248_s27, %s3241_s14 }
  0x48   : > { %p3251_p12 = por %p3250_p10, %p3249_p9 }
  0x4a   : > { %p3252_p13 = pnand %p3251_p12, %p3245_p8 }
  0x4c   : > { %3255 = shalt.err (!%p3252_p13)
}
  0x4d   : > { %s4029_s25 = smov 8   ;;  %s4030_s24 = smov 128  }
  0x4e   : > { %3051 = dma.hbm_to_vmem [thread:$0]  (!%p3554_p6), %s478_s11, 512, %s480_s19, %s3564_s29, %s4030_s24, %s4030_s24, %s4029_s25  }
  0x4f   : > { %s4031_s9 = sld [smem:[#allocation27_spill]]  ;;  %p3258_p2 = pneg %p3625_p3 }
  0x50   : > { %s3267_s27 = scalar_lea.vmem %s3614_s16, 256  ;;  %p3275_p9 = scmp.lt.s32.totalorder %s3614_s16, %s3614_s16 }
  0x51   : > { %p3268_p4 = scmp.ne.s32.totalorder %s3614_s16, %s3267_s27  ;;  %p3276_p10 = scmp.lt.s32.totalorder %s3267_s27, %s3267_s27 }
  0x53   : > { %p3270_p5 = pnand %p3268_p4, %p3258_p2  ;;  %p3277_p12 = por %p3276_p10, %p3275_p9 }
  0x55   : > { %s544_s7 = scalar_lea.hbm %s4031_s9, %s3545_s22  ;;  %p3271_p8 = pneg %p3270_p5 }
  0x57   : > { %p3278_p13 = pnand %p3277_p12, %p3271_p8 }
  0x59   : > { %3281 = shalt.err (!%p3278_p13)
}
  0x5a   : > { %s4032_s0 = sld [smem:[#allocation23_spill]]  ;;  %s538_s11 = scalar_lea.vmem [#allocation11], %s3542_s21 }
  0x5b   : > { %s545_s19 = sshll.u32 %s538_s11, 4  ;;  %s3404_s15 = smov [#allocation11]   ;;  %s546_s19 = int_to_ptr.vmem [resolvable:$true] %s545_s19 }
  0x5c   : > { %s3295_s13 = scalar_lea.vmem %s546_s19, 512  ;;  %s3300_s12 = sshll.u32 %s3404_s15, 4  ;;  %s3301_s12 = int_to_ptr.vmem [resolvable:$false] %s3300_s12 }
  0x5d   : > { %p3296_p2 = scmp.ne.s32.totalorder %s546_s19, %s3295_s13  ;;  %s3302_s27 = scalar_lea.vmem %s3301_s12, 1024 }
  0x5e   : > { %p3303_p8 = scmp.lt.s32.totalorder %s546_s19, %s3301_s12  ;;  %p3304_p9 = scmp.lt.s32.totalorder %s3302_s27, %s3295_s13 }
  0x5f   : > { %p3298_p4 = pnand %p3296_p2, %p3174_p7 }
  0x60   : > { %3044 = dma.hbm_to_vmem [thread:$0]  (!%p3625_p3), %s4032_s0, 256, %s3614_s16, [#allocation4], %s4030_s24, %s4030_s24, %s4029_s25  }
  0x61   : > { %p3299_p5 = pneg %p3298_p4  ;;  %p3305_p10 = por %p3304_p9, %p3303_p8 }
  0x63   : > { %p3306_p12 = pnand %p3305_p10, %p3299_p5 }
  0x65   : > { %3309 = shalt.err (!%p3306_p12)
}
  0x66   : > { %3057 = dma.hbm_to_vmem [thread:$0]  (!%p3554_p6), %s544_s7, 512, %s546_s19, %s3580_s23, %s4030_s24, %s4030_s24, %s4029_s25  }
  0x67   : > { %575 = sbr.rel (%p3610_p1) target bundleno = 4081 (0xff1), region = 72 }
  0x6c   : > { %3359 = dma.done.wait (%p90_p11), [#allocation4], 256  }
  0x6d   : > { %3361 = vsyncadd (%p90_p11), [#allocation4], 4294967040  ;;  %s581_s17 = sand.u32 1, %s3597_s1   ;;  %s583_s29 = sand.u32 1, %s3380_s26  }
  0x6e   : > { %s2791_s14 = sshll.u32 %s583_s29, 5  ;;  %s582_s11 = scalar_lea.sflag [#allocation7], %s581_s17 }
  0x6f   : > { %s3680_s13 = scalar_lea.vmem [#allocation6], %s2791_s14 }
  0x70   : > { %3363 = dma.done.wait (%p3606_p0), %s582_s11, 1024  }
  0x71   : > { %3365 = vsyncadd (%p3606_p0), %s582_s11, 4294966272  ;;  %s3686_s22 = scalar_lea.vmem [#allocation8], %s2791_s14  ;;  %s600_s23 = scalar_lea.sflag [#allocation10], %s581_s17 }
  0x72   : > { %s3688_s20 = scalar_lea.vmem [#allocation9], %s2791_s14 }
  0x73   : > { %3367 = dma.done.wait (%p3606_p0), %s600_s23, 1024  }
  0x74   : > { %3369 = vsyncadd (%p3606_p0), %s600_s23, 4294966272  ;;  %p690_p6 = scmp.lt.s32.totalorder %s3388_s28, 1  ;;  %s4033_s15 = sld [smem:[#allocation28_spill]] }
  0x75   : > { %s4034_s27 = sld [smem:[#allocation29_spill]]  ;;  %s3730_s16 = scalar_lea.vmem [#allocation11], %s2791_s14 }
  0x76   : > { %s3696_s25 = scalar_select %p690_p6, %s3388_s28, 1 }
  0x77   : > { %p2795_p7 = scmp.ne.s32.totalorder %s3388_s28, 0 }
  0x78   : > { %s701_s11 = scalar_lea.vmem %s3987_s6, %s3696_s25  ;;  %s704_s7 = scalar_lea.vmem %s3989_s8, %s3696_s25 }
  0x79   : > { %s707_s19 = scalar_lea.vmem %s3991_s10, %s3696_s25  ;;  %718 = sbr.rel (%p2795_p7) target bundleno = 128 (0x80), region = 96 }
  0x7a   : > { %s710_s18 = scalar_lea.vmem %s4033_s15, %s3696_s25 }
  0x7b   : > { %s713_s21 = scalar_lea.vmem %s4034_s27, %s3696_s25 }
  0x7e   : > { %v719_v0 = vld [vmem:[#allocation3] sm:$0xff]  ;;  %vm721_vm0 = vcmask 261120   ;;  %v720_v1 = vld [vmem:[#allocation3 + $0x8] sm:$0xff] }
  0x7f   : > { %722 = vst.msk [vmem:[#allocation2] sm:$0xff] %vm721_vm0, %v719_v0  ;;  %723 = vst.msk [vmem:[#allocation2 + $0x8] sm:$0xff] %vm721_vm0, %v720_v1 }
  0x80 PF: > { %v729_v2 = vld [vmem:[%s3680_s13 + $0x18] sm:$0xff]  ;;  %v728_v3 = vld [vmem:[%s3680_s13 + $0x10] sm:$0xff]  ;;  %vm756_vm1 = vcmask 261120   ;;  %v727_v5 = vld [vmem:[%s3680_s13 + $0x8] sm:$0xff]  ;;  %v3405_v8 = vmov 0.0   ;;  %vm3406_vm2 = vmmov 0   ;;  %s4035_s9 = scalar_lea.vmem %s3983_s2, %s3696_s25 }
  0x81   : > { %2901 = vmatprep.subr.mxu0 %v729_v2  ;;  %v726_v6 = vld [vmem:[%s3680_s13] sm:$0xff]  ;;  %2912 = vmatprep.subr.mxu1 %v3405_v8  ;;  %s3407_s26 = smov 96   ;;  %vm841_vm3 = vcmask 64512   ;;  %s3408_s30 = smov 64   ;;  %vm2186_vm4 = vcmask 195584   ;;  %vm2183_vm5 = vcmask 130048  }
  0x82   : > { %2902 = vmatpush3.msra.mxu0 %v729_v2  ;;  %2914 = vmatprep.mubr.msk.f32.mxu1 %vm3406_vm2, %v3405_v8  ;;  %v2796_v10 = vld [vmem:[%s4035_s9] ss:$0 sm:$0xff]  ;;  %s3409_s14 = smov 88   ;;  %s3410_s13 = smov 120  }
  0x83   : > { %2903 = vmatprep.subr.mxu0 %v728_v3  ;;  %s3411_s12 = smov 56   ;;  %s3412_s17 = smov 112  }
  0x84   : > { %2904 = vmatpush3.msra.mxu0 %v728_v3  ;;  %s3413_s29 = smov 80   ;;  %s3414_s23 = smov 48  }
  0x85   : > { %2905 = vmatprep.subr.mxu0 %v727_v5  ;;  %s3415_s24 = smov 72   ;;  %s3416_s15 = smov 104  }
  0x86   : > { %v3735_v4 = vld [vmem:[#allocation2] sm:$0xff]  ;;  %2906 = vmatpush3.msra.mxu0 %v727_v5  ;;  %v3741_v7 = vld [vmem:[#allocation2 + $0x8] sm:$0xff]  ;;  %s3417_s27 = smov 40   ;;  %s3418_s0 = smov 8  }
  0x87   : > { %2909 = vmatprep.mubr.msk.f32.mxu0 %vm756_vm1, %v3735_v4  ;;  %2907 = vmatprep.subr.mxu0 %v726_v6  ;;  %s3419_s3 = smov 16   ;;  %s3420_s9 = smov 24  }
  0x88   : > { %2908 = vmatpush3.msra.mxu0 %v726_v6  ;;  %p2836_p11 = scmp.ne.s32.totalorder %s3388_s28, 1 }
  0x89   : > { %2910 = vmatmul.mubr.msk.f32.vlgmr.msra.gmra.mxu0 %vm756_vm1, %v3741_v7  ;;  %2932 = vmatprep.subr.mxu0 %v3405_v8 }
  0x8a   : > { %2934 = vmatprep.mubr.msk.f32.mxu0 %vm3406_vm2, %v3405_v8 }
 0x149   : > { %v2911_v9 = vpop.f32.mrf.mxu0 }
 0x14a   : > { %v3759_v13 = vadd.f32 %v2911_v9, %v2796_v10 }
 0x14b   : > { %v829_v11 = vpop.f32.mrf.mxu0 }
 0x14c   : > { %v3756_v12 = vadd.f32 %v2796_v10, %v829_v11 }
 0x14e   : > { %839 = vrot.lane.b32.xlu0 %v3756_v12, %s3407_s26 }
 0x152   : > { %917 = vrot.lane.b32.xlu0 %v3759_v13, %s3407_s26 }
 0x1c0   : > { %v840_v14 = vpop.permute.xlu0 %839 }
 0x1c1   : > { %2913 = vmatpush3.xpose.msk.msra.mxu1 %vm841_vm3, %v840_v14 }
 0x1c2   : > { %2917 = vmatprep.subr.mxu1 %v3405_v8 }
 0x1c4   : > { %2915 = vmatmul.mubr.msk.f32.vlgmr.msra.gmra.mxu1 %vm841_vm3, %v3756_v12  ;;  %v918_v15 = vpop.permute.xlu0 %917 }
 0x1c5   : > { %2918 = vmatpush3.xpose.msk.msra.mxu1 %vm841_vm3, %v918_v15  ;;  %2919 = vmatprep.mubr.msk.f32.mxu1 %vm3406_vm2, %v3405_v8 }
 0x1c6   : > { %2922 = vmatprep.subr.mxu1 %v3405_v8 }
 0x1c8   : > { %2920 = vmatmul.mubr.msk.f32.vlgmr.msra.gmra.mxu1 %vm841_vm3, %v3759_v13 }
 0x1c9   : > { %2924 = vmatprep.mubr.msk.f32.mxu1 %vm3406_vm2, %v3405_v8 }
 0x284   : > { %v912_v16 = vpop.f32.mrf.mxu1 }
 0x285   : > { %v993_v17 = vsel %vm841_vm3, %v912_v16, -inf }
 0x286   : > { %994 = vmax.xlane.f32.xlu1 %v993_v17  ;;  %v2916_v18 = vpop.f32.mrf.mxu1 }
 0x288   : > { %v989_v19 = vpop.f32.mrf.mxu1 }
 0x289   : > { %v996_v20 = vsel %vm841_vm3, %v989_v19, -inf }
 0x28a   : > { %997 = vmax.xlane.f32.xlu1 %v996_v20  ;;  %v2921_v21 = vpop.f32.mrf.mxu1 }
 0x29b   : > { %1015 = vrot.lane.b32.xlu1 %v3756_v12, %s3408_s30 }
 0x29f   : > { %1091 = vrot.lane.b32.xlu1 %v3759_v13, %s3408_s30  ;;  %s4036_s30 = scalar_lea.vmem %s3985_s4, %s3696_s25 }
 0x2a3   : > { %1169 = vrot.lane.b32.xlu1 %v3756_v12, %s3409_s14 }
 0x2a7   : > { %1247 = vrot.lane.b32.xlu1 %v3759_v13, %s3409_s14 }
 0x30f   : > { %v995_v22 = vpop.xlane.xlu1 %994 }
 0x310   : > { %v999_v23 = vsub.f32 %v912_v16, %v995_v22 }
 0x312   : > { %v1001_v24 = vmul.f32 1.442695, %v999_v23 }
 0x313   : > { %v998_v25 = vpop.xlane.xlu1 %997 }
 0x314   : > { %3132 = vpow2.f32 %v1001_v24  ;;  %v1000_v26 = vsub.f32 %v989_v19, %v998_v25 }
 0x316   : > { %v1003_v27 = vmul.f32 1.442695, %v1000_v26 }
 0x317   : > { %v1016_v28 = vpop.permute.xlu1 %1015 }
 0x318   : > { %3134 = vpow2.f32 %v1003_v27  ;;  %2923 = vmatpush3.msra.mxu1 %v1016_v28 }
 0x319   : > { %2927 = vmatprep.subr.mxu1 %v3405_v8 }
 0x31b   : > { %v1092_v29 = vpop.permute.xlu1 %1091 }
 0x31f   : > { %v1170_v30 = vpop.permute.xlu1 %1169 }
 0x320   : > { %2933 = vmatpush3.xpose.msk.msra.mxu0 %vm841_vm3, %v1170_v30 }
 0x321   : > { %v3133_v31 = vpop.eup %3132  ;;  %2942 = vmatprep.subr.mxu0 %v3405_v8 }
 0x322   : > { %v1005_v32 = vsel %vm841_vm3, %v3133_v31, 0.0 }
 0x323   : > { %1006 = vadd.xlane.f32.xlu0 %v1005_v32  ;;  %v1248_v35 = vpop.permute.xlu1 %1247 }
 0x325   : > { %v3135_v33 = vpop.eup %3134 }
 0x326   : > { %v1008_v34 = vsel %vm841_vm3, %v3135_v33, 0.0 }
 0x327   : > { %1009 = vadd.xlane.f32.xlu1 %v1008_v34 }
 0x338   : > { %1245 = vrot.lane.b32.xlu1 %v3759_v13, %s3410_s13 }
 0x339   : > { %1167 = vrot.lane.b32.xlu0 %v3756_v12, %s3410_s13 }
 0x3ac   : > { %v1007_v36 = vpop.xlane.xlu0 %1006 }
 0x3ad   : > { %3136 = vrcp.f32 %v1007_v36 }
 0x3b0   : > { %v1010_v37 = vpop.xlane.xlu1 %1009  ;;  %v1168_v38 = vpop.permute.xlu0 %1167 }
 0x3b1   : > { %3138 = vrcp.f32 %v1010_v37  ;;  %2935 = vmatmul.mubr.msk.f32.vlgmr.msra.gmra.mxu0 %vm841_vm3, %v1168_v38 }
 0x3b2   : > { %2944 = vmatprep.mubr.msk.f32.mxu0 %vm3406_vm2, %v3405_v8 }
 0x3b4   : > { %v1246_v43 = vpop.permute.xlu1 %1245 }
 0x3ba   : > { %v3137_v39 = vpop.eup %3136 }
 0x3bb   : > { %v1013_v40 = vmul.f32 %v3137_v39, %v3133_v31 }
 0x3bd   : > { %2925 = vmatmul.mubr.msk.f32.vlgmr.msra.gmra.mxu1 %vm841_vm3, %v1013_v40 }
 0x3be   : > { %v3139_v41 = vpop.eup %3138  ;;  %2928 = vmatpush3.msra.mxu1 %v1092_v29  ;;  %2929 = vmatprep.mubr.msk.f32.mxu1 %vm3406_vm2, %v3405_v8 }
 0x3bf   : > { %2937 = vmatprep.subr.mxu1 %v3405_v8  ;;  %v1014_v42 = vmul.f32 %v3139_v41, %v3135_v33 }
 0x3c1   : > { %2930 = vmatmul.mubr.msk.f32.vlgmr.msra.gmra.mxu1 %vm841_vm3, %v1014_v42 }
 0x3c2   : > { %2938 = vmatpush3.xpose.msk.msra.mxu1 %vm841_vm3, %v1248_v35  ;;  %2939 = vmatprep.mubr.msk.f32.mxu1 %vm3406_vm2, %v3405_v8 }
 0x3c3   : > { %2947 = vmatprep.subr.mxu1 %v3405_v8 }
 0x3c5   : > { %2940 = vmatmul.mubr.msk.f32.vlgmr.msra.gmra.mxu1 %vm841_vm3, %v1246_v43 }
 0x3c6   : > { %2949 = vmatprep.mubr.msk.f32.mxu1 %vm3406_vm2, %v3405_v8 }
 0x471   : > { %v1241_v44 = vpop.f32.mrf.mxu0 }
 0x472   : > { %v1323_v45 = vsel %vm841_vm3, %v1241_v44, -inf }
 0x473   : > { %1324 = vmax.xlane.f32.xlu1 %v1323_v45  ;;  %v2936_v46 = vpop.f32.mrf.mxu0 }
 0x47d   : > { %v3803_v47 = vpop.f32.mrf.mxu1 }
 0x47f   : > { %v2926_v48 = vpop.f32.mrf.mxu1 }
 0x481   : > { %v3805_v49 = vpop.f32.mrf.mxu1 }
 0x483   : > { %v2931_v50 = vpop.f32.mrf.mxu1 }
 0x485   : > { %v1319_v51 = vpop.f32.mrf.mxu1 }
 0x486   : > { %v1326_v52 = vsel %vm841_vm3, %v1319_v51, -inf }
 0x487   : > { %1327 = vmax.xlane.f32.xlu0 %v1326_v52  ;;  %v2941_v53 = vpop.f32.mrf.mxu1 }
 0x49d   : > { %1421 = vrot.lane.b32.xlu0 %v3759_v13, %s3411_s12 }
 0x4a1   : > { %1497 = vrot.lane.b32.xlu0 %v3756_v12, %s3412_s17 }
 0x4fc   : > { %v1325_v54 = vpop.xlane.xlu1 %1324 }
 0x4fd   : > { %v1329_v55 = vsub.f32 %v1241_v44, %v1325_v54 }
 0x4ff   : > { %v1331_v56 = vmul.f32 1.442695, %v1329_v55 }
 0x501   : > { %3140 = vpow2.f32 %v1331_v56 }
 0x50e   : > { %v3141_v57 = vpop.eup %3140 }
 0x50f   : > { %v1335_v58 = vsel %vm841_vm3, %v3141_v57, 0.0 }
 0x510   : > { %1336 = vadd.xlane.f32.xlu1 %v1335_v58  ;;  %v1328_v59 = vpop.xlane.xlu0 %1327 }
 0x511   : > { %v1330_v61 = vsub.f32 %v1319_v51, %v1328_v59 }
 0x513   : > { %v1333_v62 = vmul.f32 1.442695, %v1330_v61 }
 0x514   : > { %v1422_v60 = vpop.permute.xlu0 %1421 }
 0x515   : > { %2948 = vmatpush3.msra.mxu1 %v1422_v60  ;;  %3142 = vpow2.f32 %v1333_v62 }
 0x516   : > { %2957 = vmatprep.subr.mxu1 %v3405_v8 }
 0x518   : > { %v1498_v9 = vpop.permute.xlu0 %1497 }
 0x521   : > { %1345 = vrot.lane.b32.xlu1 %v3756_v12, %s3411_s12  ;;  %s4037_s12 = scalar_lea.vmem %s3986_s5, %s3696_s25 }
 0x522   : > { %v3143_v63 = vpop.eup %3142 }
 0x523   : > { %v1338_v0 = vsel %vm841_vm3, %v3143_v63, 0.0 }
 0x525   : > { %1499 = vrot.lane.b32.xlu1 %v3756_v12, %s3413_s29 }
 0x529   : > { %1577 = vrot.lane.b32.xlu1 %v3759_v13, %s3413_s29 }
 0x54d   : > { %1339 = vadd.xlane.f32.xlu1 %v1338_v0 }
 0x55e   : > { %1575 = vrot.lane.b32.xlu1 %v3759_v13, %s3412_s17 }
 0x599   : > { %v1337_v1 = vpop.xlane.xlu1 %1336 }
 0x59a   : > { %3144 = vrcp.f32 %v1337_v1 }
 0x59d   : > { %v1346_v2 = vpop.permute.xlu1 %1345 }
 0x59e   : > { %2943 = vmatpush3.msra.mxu0 %v1346_v2 }
 0x59f   : > { %2952 = vmatprep.subr.mxu0 %v3405_v8 }
 0x5a1   : > { %v1500_v6 = vpop.permute.xlu1 %1499 }
 0x5a5   : > { %v1578_v10 = vpop.permute.xlu1 %1577 }
 0x5a7   : > { %v3145_v3 = vpop.eup %3144 }
 0x5a8   : > { %v1343_v5 = vmul.f32 %v3145_v3, %v3141_v57 }
 0x5aa   : > { %2945 = vmatmul.mubr.msk.f32.vlgmr.msra.gmra.mxu0 %vm841_vm3, %v1343_v5 }
 0x5ab   : > { %2953 = vmatpush3.xpose.msk.msra.mxu0 %vm841_vm3, %v1500_v6  ;;  %2954 = vmatprep.mubr.msk.f32.mxu0 %vm3406_vm2, %v3405_v8 }
 0x5ac   : > { %2962 = vmatprep.subr.mxu0 %v3405_v8 }
 0x5ae   : > { %2955 = vmatmul.mubr.msk.f32.vlgmr.msra.gmra.mxu0 %vm841_vm3, %v1498_v9 }
 0x5af   : > { %2964 = vmatprep.mubr.msk.f32.mxu0 %vm3406_vm2, %v3405_v8 }
 0x5d6   : > { %v1340_v11 = vpop.xlane.xlu1 %1339 }
 0x5d7   : > { %3146 = vrcp.f32 %v1340_v11 }
 0x5da   : > { %v1576_v16 = vpop.permute.xlu1 %1575 }
 0x5e4   : > { %v3147_v14 = vpop.eup %3146 }
 0x5e5   : > { %v1344_v15 = vmul.f32 %v3147_v14, %v3143_v63 }
 0x5e7   : > { %2950 = vmatmul.mubr.msk.f32.vlgmr.msra.gmra.mxu1 %vm841_vm3, %v1344_v15 }
 0x5e8   : > { %2958 = vmatpush3.xpose.msk.msra.mxu1 %vm841_vm3, %v1578_v10  ;;  %2959 = vmatprep.mubr.msk.f32.mxu1 %vm3406_vm2, %v3405_v8 }
 0x5e9   : > { %2967 = vmatprep.subr.mxu1 %v3405_v8 }
 0x5eb   : > { %2960 = vmatmul.mubr.msk.f32.vlgmr.msra.gmra.mxu1 %vm841_vm3, %v1576_v16 }
 0x5ec   : > { %2969 = vmatprep.mubr.msk.f32.mxu1 %vm3406_vm2, %v3405_v8 }
 0x66a   : > { %v3834_v17 = vpop.f32.mrf.mxu0 }
 0x66c   : > { %v2946_v18 = vpop.f32.mrf.mxu0 }
 0x66d   : > { %v734_v18 = vld [vmem:[%s3686_s22 + $0x18] sm:$0xff] }
 0x66e   : > { %v1571_v19 = vpop.f32.mrf.mxu0 }
 0x66f   : > { %v1653_v20 = vsel %vm841_vm3, %v1571_v19, -inf }
 0x670   : > { %1654 = vmax.xlane.f32.xlu0 %v1653_v20  ;;  %v2956_v21 = vpop.f32.mrf.mxu0  ;;  %v731_v20 = vld [vmem:[%s3686_s22] sm:$0xff] }
 0x6a7   : > { %v3837_v22 = vpop.f32.mrf.mxu1 }
 0x6a9   : > { %v2951_v23 = vpop.f32.mrf.mxu1 }
 0x6ab   : > { %v1649_v24 = vpop.f32.mrf.mxu1 }
 0x6ac   : > { %v1656_v25 = vsel %vm841_vm3, %v1649_v24, -inf }
 0x6ad   : > { %1657 = vmax.xlane.f32.xlu1 %v1656_v25  ;;  %v2961_v26 = vpop.f32.mrf.mxu1 }
 0x6be   : > { %1675 = vrot.lane.b32.xlu1 %v3756_v12, %s3414_s23 }
 0x6c2   : > { %1829 = vrot.lane.b32.xlu1 %v3756_v12, %s3415_s24 }
 0x6c6   : > { %1907 = vrot.lane.b32.xlu1 %v3759_v13, %s3415_s24 }
 0x6ca   : > { %1905 = vrot.lane.b32.xlu1 %v3759_v13, %s3416_s15 }
 0x6f9   : > { %v1655_v27 = vpop.xlane.xlu0 %1654 }
 0x6fa   : > { %v1659_v28 = vsub.f32 %v1571_v19, %v1655_v27  ;;  %v733_v19 = vld [vmem:[%s3686_s22 + $0x10] sm:$0xff] }
 0x6fc   : > { %v1661_v29 = vmul.f32 1.442695, %v1659_v28 }
 0x6fe   : > { %3148 = vpow2.f32 %v1661_v29 }
 0x70b   : > { %v3149_v30 = vpop.eup %3148 }
 0x70c   : > { %v1665_v31 = vsel %vm841_vm3, %v3149_v30, 0.0 }
 0x70d   : > { %1666 = vadd.xlane.f32.xlu0 %v1665_v31 }
 0x723   : > { %1751 = vrot.lane.b32.xlu0 %v3759_v13, %s3414_s23 }
 0x736   : > { %v1658_v32 = vpop.xlane.xlu1 %1657 }
 0x737   : > { %v1660_v33 = vsub.f32 %v1649_v24, %v1658_v32 }
 0x739   : > { %v1663_v34 = vmul.f32 1.442695, %v1660_v33 }
 0x73a   : > { %v1676_v35 = vpop.permute.xlu1 %1675 }
 0x73b   : > { %3150 = vpow2.f32 %v1663_v34  ;;  %2963 = vmatpush3.msra.mxu0 %v1676_v35 }
 0x73c   : > { %2972 = vmatprep.subr.mxu0 %v3405_v8 }
 0x73e   : > { %v1830_v42 = vpop.permute.xlu1 %1829 }
 0x742   : > { %v1908_v46 = vpop.permute.xlu1 %1907 }
 0x746   : > { %v1906_v50 = vpop.permute.xlu1 %1905 }
 0x748   : > { %v3151_v36 = vpop.eup %3150 }
 0x749   : > { %v1668_v37 = vsel %vm841_vm3, %v3151_v36, 0.0 }
 0x74a   : > { %1669 = vadd.xlane.f32.xlu0 %v1668_v37 }
 0x760   : > { %1827 = vrot.lane.b32.xlu0 %v3756_v12, %s3416_s15 }
 0x796   : > { %v1667_v38 = vpop.xlane.xlu0 %1666 }
 0x797   : > { %3152 = vrcp.f32 %v1667_v38 }
 0x79a   : > { %v1752_v39 = vpop.permute.xlu0 %1751 }
 0x79b   : > { %2968 = vmatpush3.msra.mxu1 %v1752_v39 }
 0x79c   : > { %2977 = vmatprep.subr.mxu1 %v3405_v8 }
 0x7a4   : > { %v3153_v40 = vpop.eup %3152 }
 0x7a5   : > { %v1673_v41 = vmul.f32 %v3153_v40, %v3149_v30 }
 0x7a7   : > { %2965 = vmatmul.mubr.msk.f32.vlgmr.msra.gmra.mxu0 %vm841_vm3, %v1673_v41 }
 0x7a8   : > { %2973 = vmatpush3.xpose.msk.msra.mxu0 %vm841_vm3, %v1830_v42  ;;  %2974 = vmatprep.mubr.msk.f32.mxu0 %vm3406_vm2, %v3405_v8 }
 0x7a9   : > { %2982 = vmatprep.subr.mxu0 %v3405_v8 }
 0x7d3   : > { %v1670_v43 = vpop.xlane.xlu0 %1669 }
 0x7d4   : > { %3154 = vrcp.f32 %v1670_v43 }
 0x7d7   : > { %v1828_v44 = vpop.permute.xlu0 %1827 }
 0x7d8   : > { %2975 = vmatmul.mubr.msk.f32.vlgmr.msra.gmra.mxu0 %vm841_vm3, %v1828_v44 }
 0x7d9   : > { %2984 = vmatprep.mubr.msk.f32.mxu0 %vm3406_vm2, %v3405_v8 }
 0x7e1   : > { %v3155_v45 = vpop.eup %3154 }
 0x7e2   : > { %v1674_v48 = vmul.f32 %v3155_v45, %v3151_v36 }
 0x7e4   : > { %2970 = vmatmul.mubr.msk.f32.vlgmr.msra.gmra.mxu1 %vm841_vm3, %v1674_v48 }
 0x7e5   : > { %2978 = vmatpush3.xpose.msk.msra.mxu1 %vm841_vm3, %v1908_v46  ;;  %2979 = vmatprep.mubr.msk.f32.mxu1 %vm3406_vm2, %v3405_v8 }
 0x7e6   : > { %2987 = vmatprep.subr.mxu1 %v3405_v8 }
 0x7e8   : > { %2980 = vmatmul.mubr.msk.f32.vlgmr.msra.gmra.mxu1 %vm841_vm3, %v1906_v50 }
 0x7e9   : > { %2989 = vmatprep.mubr.msk.f32.mxu1 %vm3406_vm2, %v3405_v8 }
 0x867   : > { %v1747_v51 = vpop.f32.mrf.mxu0 }
 0x869   : > { %v2966_v52 = vpop.f32.mrf.mxu0 }
 0x898   : > { %v1901_v53 = vpop.f32.mrf.mxu0 }
 0x899   : > { %v1983_v54 = vsel %vm841_vm3, %v1901_v53, -inf }
 0x89a   : > { %1984 = vmax.xlane.f32.xlu0 %v1983_v54  ;;  %v2976_v55 = vpop.f32.mrf.mxu0  ;;  %v741_v54 = vld [vmem:[%s3688_s20 + $0x18] sm:$0xff] }
 0x89b   : > { %v740_v55 = vld [vmem:[%s3688_s20 + $0x10] sm:$0xff] }
 0x8a4   : > { %v1823_v56 = vpop.f32.mrf.mxu1 }
 0x8a6   : > { %v2971_v57 = vpop.f32.mrf.mxu1 }
 0x8a7   : > { %v738_v57 = vld [vmem:[%s3688_s20] sm:$0xff] }
 0x8a8   : > { %v1979_v58 = vpop.f32.mrf.mxu1 }
 0x8a9   : > { %v1986_v59 = vsel %vm841_vm3, %v1979_v58, -inf }
 0x8aa   : > { %1987 = vmax.xlane.f32.xlu1 %v1986_v59  ;;  %v2981_v60 = vpop.f32.mrf.mxu1 }
 0x8bb   : > { %2005 = vrot.lane.b32.xlu1 %v3756_v12, %s3417_s27 }
 0x8bf   : > { %2159 = vrot.lane.b32.xlu1 %v3834_v17, %s3418_s0 }
 0x8c3   : > { %2161 = vrot.lane.b32.xlu1 %v3837_v22, %s3418_s0 }
 0x8c7   : > { %2169 = vrot.lane.b32.xlu1 %v1823_v56, %s3419_s3  ;;  %v739_v56 = vld [vmem:[%s3688_s20 + $0x8] sm:$0xff] }
 0x923   : > { %v1985_v8 = vpop.xlane.xlu0 %1984 }
 0x924   : > { %v1989_v61 = vsub.f32 %v1901_v53, %v1985_v8 }
 0x926   : > { %v1991_v62 = vmul.f32 1.442695, %v1989_v61 }
 0x928   : > { %3156 = vpow2.f32 %v1991_v62 }
 0x933   : > { %v1988_v63 = vpop.xlane.xlu1 %1987 }
 0x934   : > { %v1990_v0 = vsub.f32 %v1979_v58, %v1988_v63 }
 0x935   : > { %v3157_v1 = vpop.eup %3156 }
 0x936   : > { %v1993_v2 = vmul.f32 1.442695, %v1990_v0  ;;  %v1995_v3 = vsel %vm841_vm3, %v3157_v1, 0.0  ;;  %v2826_v0 = vld [vmem:[%s4037_s12] ss:$0 sm:$0xff] }
 0x937   : > { %v2006_v12 = vpop.permute.xlu1 %2005  ;;  %1996 = vadd.xlane.f32.xlu0 %v1995_v3 }
 0x938   : > { %3158 = vpow2.f32 %v1993_v2  ;;  %2983 = vmatpush3.msra.mxu0 %v2006_v12  ;;  %v2827_v2 = vld [vmem:[%s701_s11] ss:$0 sm:$0xff] }
 0x939   : > { %2992 = vmatprep.subr.mxu0 %v734_v18 }
 0x93b   : > { %v2160_v25 = vpop.permute.xlu1 %2159 }
 0x93c   : > { %v2181_v27 = vsel %vm841_vm3, %v3803_v47, %v2160_v25  ;;  %v2823_v47 = vld [vmem:[%s4036_s30] ss:$0 sm:$0xff] }
 0x93d   : > { %v2831_v25 = vld [vmem:[%s707_s19] ss:$0 sm:$0xff] }
 0x93f   : > { %v2162_v31 = vpop.permute.xlu1 %2161 }
 0x940   : > { %v2182_v33 = vsel %vm841_vm3, %v3805_v49, %v2162_v31 }
 0x943   : > { %v2170_v32 = vpop.permute.xlu1 %2169 }
 0x944   : > { %v2185_v34 = vsel %vm2183_vm5, %v2182_v33, %v2170_v32 }
 0x945   : > { %v3159_v5 = vpop.eup %3158 }
 0x946   : > { %v1998_v6 = vsel %vm841_vm3, %v3159_v5, 0.0 }
 0x947   : > { %1999 = vadd.xlane.f32.xlu0 %v1998_v6 }
 0x95d   : > { %2081 = vrot.lane.b32.xlu0 %v3759_v13, %s3417_s27  ;;  %v732_v13 = vld [vmem:[%s3686_s22 + $0x8] sm:$0xff] }
 0x961   : > { %2167 = vrot.lane.b32.xlu0 %v1747_v51, %s3419_s3 }
 0x9c0   : > { %v1997_v9 = vpop.xlane.xlu0 %1996 }
 0x9c1   : > { %3160 = vrcp.f32 %v1997_v9 }
 0x9ce   : > { %v3161_v10 = vpop.eup %3160 }
 0x9cf   : > { %v2003_v11 = vmul.f32 %v3161_v10, %v3157_v1 }
 0x9d0   : > { %v2000_v14 = vpop.xlane.xlu0 %1999 }
 0x9d1   : > { %3162 = vrcp.f32 %v2000_v14  ;;  %2985 = vmatmul.mubr.msk.f32.vlgmr.msra.gmra.mxu0 %vm841_vm3, %v2003_v11  ;;  %v746_v11 = vld [vmem:[%s3730_s16 + $0x18] sm:$0xff]  ;;  %v745_v14 = vld [vmem:[%s3730_s16 + $0x10] sm:$0xff] }
 0x9d2   : > { %2993 = vmatpush3.msra.mxu0 %v734_v18 }
 0x9d3   : > { %2994 = vmatprep.subr.mxu0 %v733_v19 }
 0x9d4   : > { %v2082_v15 = vpop.permute.xlu0 %2081  ;;  %2995 = vmatpush3.msra.mxu0 %v733_v19 }
 0x9d5   : > { %2988 = vmatpush3.msra.mxu1 %v2082_v15  ;;  %2996 = vmatprep.subr.mxu0 %v732_v13  ;;  %v744_v15 = vld [vmem:[%s3730_s16 + $0x8] sm:$0xff] }
 0x9d6   : > { %2997 = vmatpush3.msra.mxu0 %v732_v13  ;;  %3003 = vmatprep.subr.mxu1 %v741_v54 }
 0x9d7   : > { %2998 = vmatprep.subr.mxu0 %v731_v20 }
 0x9d8   : > { %2999 = vmatpush3.msra.mxu0 %v731_v20  ;;  %v2168_v26 = vpop.permute.xlu0 %2167 }
 0x9d9   : > { %v2184_v28 = vsel %vm2183_vm5, %v2181_v27, %v2168_v26  ;;  %3014 = vmatprep.subr.mxu0 %v746_v11 }
 0x9de   : > { %v3163_v16 = vpop.eup %3162 }
 0x9df   : > { %v2004_v17 = vmul.f32 %v3163_v16, %v3159_v5  ;;  %v743_v16 = vld [vmem:[%s3730_s16] sm:$0xff] }
 0x9e1   : > { %2990 = vmatmul.mubr.msk.f32.vlgmr.msra.gmra.mxu1 %vm841_vm3, %v2004_v17  ;;  %v2828_v17 = vld [vmem:[%s704_s7] ss:$0 sm:$0xff] }
 0x9e2   : > { %3004 = vmatpush3.msra.mxu1 %v741_v54 }
 0x9e3   : > { %3005 = vmatprep.subr.mxu1 %v740_v55 }
 0x9e4   : > { %3006 = vmatpush3.msra.mxu1 %v740_v55 }
 0x9e5   : > { %3007 = vmatprep.subr.mxu1 %v739_v56 }
 0x9e6   : > { %3008 = vmatpush3.msra.mxu1 %v739_v56 }
 0x9e7   : > { %3009 = vmatprep.subr.mxu1 %v738_v57 }
 0x9e8   : > { %3010 = vmatpush3.msra.mxu1 %v738_v57 }
 0xa91   : > { %v2077_v21 = vpop.f32.mrf.mxu0 }
 0xa92   : > { %2175 = vrot.lane.b32.xlu0 %v2077_v21, %s3420_s9 }
 0xa93   : > { %v2986_v22 = vpop.f32.mrf.mxu0 }
 0xaa1   : > { %v2153_v23 = vpop.f32.mrf.mxu1 }
 0xaa2   : > { %2177 = vrot.lane.b32.xlu1 %v2153_v23, %s3420_s9 }
 0xaa3   : > { %v2991_v24 = vpop.f32.mrf.mxu1 }
 0xb04   : > { %v2176_v29 = vpop.permute.xlu0 %2175 }
 0xb05   : > { %v2187_v30 = vsel %vm2186_vm4, %v2184_v28, %v2176_v29 }
 0xb06   : > { %3000 = vmatprep.mubr.msk.f32.mxu0 %vm756_vm1, %v2187_v30 }
 0xb14   : > { %v2178_v35 = vpop.permute.xlu1 %2177 }
 0xb15   : > { %v2188_v36 = vsel %vm2186_vm4, %v2185_v34, %v2178_v35 }
 0xb16   : > { %3001 = vmatmul.mubr.msk.f32.vlgmr.msra.gmra.mxu0 %vm756_vm1, %v2188_v36 }
 0xb17   : > { %3015 = vmatpush3.msra.mxu0 %v746_v11 }
 0xb18   : > { %3016 = vmatprep.subr.mxu0 %v745_v14 }
 0xb19   : > { %3017 = vmatpush3.msra.mxu0 %v745_v14 }
 0xb1a   : > { %3018 = vmatprep.subr.mxu0 %v744_v15 }
 0xb1b   : > { %3019 = vmatpush3.msra.mxu0 %v744_v15 }
 0xb1c   : > { %3020 = vmatprep.subr.mxu0 %v743_v16 }
 0xb1d   : > { %3021 = vmatpush3.msra.mxu0 %v743_v16 }
 0xbd6   : > { %v3002_v37 = vpop.f32.mrf.mxu0 }
 0xbd7   : > { %v2273_v38 = vadd.f32 %v3002_v37, %v2823_v47 }
 0xbd8   : > { %v2267_v39 = vpop.f32.mrf.mxu0 }
 0xbd9   : > { %v2268_v40 = vadd.f32 %v2823_v47, %v2267_v39  ;;  %v2277_v41 = vadd.f32 %v2273_v38, %v3741_v7 }
 0xbdb   : > { %v2281_v42 = vsel %vm756_vm1, %v2277_v41, 0.0  ;;  %v2276_v49 = vadd.f32 %v2268_v40, %v3735_v4 }
 0xbdc   : > { %2282 = vadd.xlane.f32.xlu1 %v2281_v42 }
 0xbdd   : > { %v2278_v43 = vsel %vm756_vm1, %v2276_v49, 0.0 }
 0xbde   : > { %2279 = vadd.xlane.f32.xlu0 %v2278_v43 }
 0xc65   : > { %v2283_v44 = vpop.xlane.xlu1 %2282 }
 0xc66   : > { %v2286_v45 = vmul.f32 0.03125, %v2283_v44 }
 0xc67   : > { %v2280_v46 = vpop.xlane.xlu0 %2279 }
 0xc68   : > { %v2285_v48 = vmul.f32 0.03125, %v2280_v46  ;;  %v2288_v50 = vsub.f32 %v2277_v41, %v2286_v45 }
 0xc6a   : > { %v2287_v51 = vsub.f32 %v2276_v49, %v2285_v48  ;;  %v2290_v53 = vmul.f32 %v2288_v50, %v2288_v50 }
 0xc6c   : > { %v2289_v52 = vmul.f32 %v2287_v51, %v2287_v51  ;;  %v2294_v4 = vsel %vm756_vm1, %v2290_v53, 0.0  ;;  %v2835_v53 = vld [vmem:[%s713_s21] ss:$0 sm:$0xff] }
 0xc6e   : > { %v2291_v7 = vsel %vm756_vm1, %v2289_v52, 0.0 }
 0xc6f   : > { %2292 = vadd.xlane.f32.xlu0 %v2291_v7 }
 0xc73   : > { %2295 = vadd.xlane.f32.xlu0 %v2294_v4 }
 0xcf8   : > { %v2293_v58 = vpop.xlane.xlu0 %2292 }
 0xcf9   : > { %v2297_v59 = vmul.f32 0.03125, %v2293_v58 }
 0xcfb   : > { %v2299_v60 = vadd.f32 1e-05, %v2297_v59 }
 0xcfc   : > { %v2296_v8 = vpop.xlane.xlu0 %2295 }
 0xcfd   : > { %3164 = vrsqrt.f32 %v2299_v60  ;;  %v2298_v61 = vmul.f32 0.03125, %v2296_v8 }
 0xcff   : > { %v2300_v62 = vadd.f32 1e-05, %v2298_v61 }
 0xd01   : > { %3166 = vrsqrt.f32 %v2300_v62 }
 0xd0a   : > { %v3165_v63 = vpop.eup %3164 }
 0xd0b   : > { %v2303_v1 = vmul.f32 %v3165_v63, %v2287_v51  ;;  %v2834_v51 = vld [vmem:[%s710_s18] ss:$0 sm:$0xff] }
 0xd0d   : > { %v2311_v3 = vmul.f32 %v2826_v0, %v2303_v1 }
 0xd0e   : > { %v3167_v12 = vpop.eup %3166 }
 0xd0f   : > { %v2304_v5 = vmul.f32 %v3167_v12, %v2288_v50  ;;  %v2319_v6 = vadd.f32 %v2827_v2, %v2311_v3 }
 0xd11   : > { %v2312_v9 = vmul.f32 %v2826_v0, %v2304_v5  ;;  %3011 = vmatprep.mubr.msk.f32.mxu1 %vm756_vm1, %v2319_v6 }
 0xd13   : > { %v2320_v10 = vadd.f32 %v2827_v2, %v2312_v9 }
 0xd15   : > { %3012 = vmatmul.mubr.msk.f32.vlgmr.msra.gmra.mxu1 %vm756_vm1, %v2320_v10 }
 0xdd5   : > { %v3013_v18 = vpop.f32.mrf.mxu1 }
 0xdd6   : > { %v2405_v19 = vadd.f32 %v3013_v18, %v2828_v17 }
 0xdd7   : > { %v2399_v13 = vpop.f32.mrf.mxu1 }
 0xdd8   : > { %v2400_v20 = vadd.f32 %v2828_v17, %v2399_v13  ;;  %v2409_v21 = vmul.f32 0.01, %v2405_v19 }
 0xdda   : > { %v2408_v22 = vmul.f32 0.01, %v2400_v20  ;;  %v2411_v24 = vmax.f32 %v2405_v19, %v2409_v21 }
 0xddc   : > { %v2410_v23 = vmax.f32 %v2400_v20, %v2408_v22 }
 0xdde   : > { %3022 = vmatprep.mubr.msk.f32.mxu0 %vm756_vm1, %v2410_v23 }
 0xddf   : > { %3023 = vmatmul.mubr.msk.f32.vlgmr.msra.gmra.mxu0 %vm756_vm1, %v2411_v24 }
 0xe9f   : > { %v3024_v26 = vpop.f32.mrf.mxu0 }
 0xea0   : > { %v2496_v27 = vadd.f32 %v3024_v26, %v2831_v25 }
 0xea1   : > { %v2490_v28 = vpop.f32.mrf.mxu0 }
 0xea2   : > { %v2491_v29 = vadd.f32 %v2831_v25, %v2490_v28  ;;  %v2500_v30 = vadd.f32 %v2496_v27, %v2320_v10 }
 0xea4   : > { %v2504_v31 = vsel %vm756_vm1, %v2500_v30, 0.0  ;;  %v2499_v32 = vadd.f32 %v2491_v29, %v2319_v6 }
 0xea5   : > { %2505 = vadd.xlane.f32.xlu0 %v2504_v31 }
 0xea6   : > { %v2501_v33 = vsel %vm756_vm1, %v2499_v32, 0.0 }
 0xea7   : > { %2502 = vadd.xlane.f32.xlu1 %v2501_v33 }
 0xf2e   : > { %v2506_v34 = vpop.xlane.xlu0 %2505 }
 0xf2f   : > { %v2508_v35 = vmul.f32 0.03125, %v2506_v34 }
 0xf30   : > { %v2503_v36 = vpop.xlane.xlu1 %2502 }
 0xf31   : > { %v2510_v47 = vsub.f32 %v2500_v30, %v2508_v35  ;;  %v2507_v37 = vmul.f32 0.03125, %v2503_v36 }
 0xf33   : > { %v2509_v38 = vsub.f32 %v2499_v32, %v2507_v37  ;;  %v2512_v39 = vmul.f32 %v2510_v47, %v2510_v47 }
 0xf35   : > { %v2516_v40 = vsel %vm756_vm1, %v2512_v39, 0.0  ;;  %v2511_v41 = vmul.f32 %v2509_v38, %v2509_v38 }
 0xf36   : > { %2517 = vadd.xlane.f32.xlu0 %v2516_v40 }
 0xf37   : > { %v2513_v42 = vsel %vm756_vm1, %v2511_v41, 0.0 }
 0xf38   : > { %2514 = vadd.xlane.f32.xlu1 %v2513_v42 }
 0xfbf   : > { %v2518_v49 = vpop.xlane.xlu0 %2517 }
 0xfc0   : > { %v2520_v43 = vmul.f32 0.03125, %v2518_v49 }
 0xfc1   : > { %v2515_v44 = vpop.xlane.xlu1 %2514 }
 0xfc2   : > { %v2522_v45 = vadd.f32 1e-05, %v2520_v43  ;;  %v2519_v46 = vmul.f32 0.03125, %v2515_v44 }
 0xfc4   : > { %3168 = vrsqrt.f32 %v2522_v45  ;;  %v2521_v48 = vadd.f32 1e-05, %v2519_v46 }
 0xfc6   : > { %3170 = vrsqrt.f32 %v2521_v48 }
 0xfd1   : > { %v3169_v50 = vpop.eup %3168 }
 0xfd2   : > { %v2526_v52 = vmul.f32 %v3169_v50, %v2510_v47 }
 0xfd3   : > { %v3171_v7 = vpop.eup %3170 }
 0xfd4   : > { %v2534_v4 = vmul.f32 %v2834_v51, %v2526_v52  ;;  %v2525_v54 = vmul.f32 %v3171_v7, %v2509_v38 }
 0xfd6   : > { %v2542_v55 = vadd.f32 %v2835_v53, %v2534_v4  ;;  %v2533_v56 = vmul.f32 %v2834_v51, %v2525_v54  ;;  %2548 = sbr.rel (%p2836_p11) target bundleno = 4060 (0xfdc), region = 100 }
 0xfd8   : > { %2544 = vst.msk [vmem:[#allocation2 + $0x8] sm:$0xff] %vm756_vm1, %v2542_v55  ;;  %v2541_v57 = vadd.f32 %v2835_v53, %v2533_v56 }
 0xfda   : > { %2543 = vst.msk [vmem:[#allocation2] sm:$0xff] %vm756_vm1, %v2541_v57 }
 0xfdb   : > { %2549 = vst.msk [vmem:[#allocation12] sm:$0xff] %vm756_vm1, %v2541_v57  ;;  %2550 = vst.msk [vmem:[#allocation12 + $0x8] sm:$0xff] %vm756_vm1, %v2542_v55 }
 0xfdc PF: > { %p3061_p0 = scmp.eq.s32.totalorder %s3597_s1, 1  ;;  %s3421_s25 = smov [#allocation12]  }
 0xfdd   : > { %s2560_s18 = sshll.u32 %s3421_s25, 4  ;;  %s2561_s18 = int_to_ptr.vmem [resolvable:$true] %s2560_s18 }
 0xfde   : > { %s3310_s21 = scalar_lea.vmem %s2561_s18, 256  ;;  %p3317_p2 = scmp.lt.s32.totalorder %s2561_s18, %s2561_s18 }
 0xfdf   : > { %p3311_p1 = scmp.ne.s32.totalorder %s2561_s18, %s3310_s21  ;;  %p3318_p4 = scmp.lt.s32.totalorder %s3310_s21, %s3310_s21 }
 0xfe1   : > { %p3312_p3 = pnand %p3311_p1, %p3061_p0  ;;  %p3319_p5 = por %p3318_p4, %p3317_p2 }
 0xfe3   : > { %p3313_p13 = pneg %p3312_p3 }
 0xfe5   : > { %p3320_p8 = pnand %p3319_p5, %p3313_p13 }
 0xfe7   : > { %3323 = shalt.err (!%p3320_p8)
}
 0xfe8   : > { %s3422_s28 = smov 128   ;;  %s4040_s26 = sld [smem:[#allocation30_spill]] }
 0xfee   : > { %3038 = dma.vmem_to_hbm [thread:$0]  (%p3061_p0), %s2561_s18, 256, %s4040_s26, [#allocation5], %s3422_s28, %s3422_s28, %s3418_s0  }
 0xfef   : > { %3371 = dma.done.wait (%p3061_p0), [#allocation5], 256  }
 0xff0   : > { %3373 = vsyncadd (%p3061_p0), [#allocation5], 4294967040 }
 0xff1 PF: > { %s4041_s30 = sld [smem:[#allocation20_spill]] }
 0xff2   : > { %s4042_s25 = sld [smem:[#allocation17_spill]] }
 0xff3   : > { %s4043_s26 = sld [smem:[#allocation18_spill]] }
 0xff4   : > { %s4044_s27 = sld [smem:[#allocation22_spill]] }
 0xff5   : > { %s4045_s28 = sld [smem:[#allocation19_spill]] }
 0xff6   : > { %s4046_s29 = sld [smem:[#allocation21_spill]] }
 0xff7   : > { %s31_s30 = sadd.s32 1, %s4041_s30  }
 0xff8   : > { %p28_p9 = scmp.ge.s32.totalorder %s31_s30, 4  }
 0xffa   :  { %30 = sbr.rel (!%p28_p9) target bundleno = 17 (0x11), region = 183 }
 0xfff   :  { %2576 = vsyncpa [#allocation4], 1 }
0x1000   :  { %2578 = vsyncpa [#allocation4 + $0x1], 1 }
0x1001   :  { %2579 = vsyncpa [#allocation7], 1 }
0x1002   :  { %2581 = vsyncpa [#allocation7 + $0x1], 1 }
0x1003   :  { %2582 = vsyncpa [#allocation10], 1 }
0x1004   :  { %2584 = vsyncpa [#allocation10 + $0x1], 1 }
0x1005   :  { %2585 = vsyncpa [#allocation5], 1 }
0x1006   :  { %2587 = vsyncpa [#allocation5 + $0x1], 1 }

</bundles_post_ra>
